<compile_context>
chip_gen: v7x
topology: tpu7x:2x2x1
jax: 0.10.0
libtpu: 0.0.40
codegen_flags: <defaults>
</compile_context>

<pallas_src>
import math

import jax
import jax.numpy as jnp
from jax.experimental import pallas as pl
from jax.experimental.pallas import tpu as pltpu

# ---------------- model dims (small, CLIP-text-like) ----------------
B = 2          # batch (number of prompts)
L = 8          # context length
D = 32         # transformer width
H = 4          # attention heads
N_LAYERS = 2   # transformer layers
E = 16         # text_projection output dim
HD = D // H
EPS = 1e-5
SCALE = 1.0 / math.sqrt(HD)


def _layer_norm(v, w, b):
    mu = jnp.mean(v, axis=-1, keepdims=True)
    var = jnp.mean((v - mu) ** 2, axis=-1, keepdims=True)
    return (v - mu) * jax.lax.rsqrt(var + EPS) * w + b


# ---------------- fused Pallas kernel: whole text encoder ----------------
def encoder_kernel(idx_ref,                                     # scalar prefetch: (B,) EOT idx
                   prompts_ref, pos_ref, mask_ref,              # (1,L,D), (L,D), (L,L)
                   ln1_w, ln1_b, wq, bq, wk, bk, wv, bv, wo, bo,
                   ln2_w, ln2_b, wfc, bfc, wproj, bproj,        # per-layer, leading dim 1
                   lnf_w, lnf_b, proj_ref,                      # (1,D), (1,D), (D,E)
                   out_ref,                                     # (1,1,E)
                   x_scratch):                                  # VMEM (L,D) resident activation
    b = pl.program_id(0)
    layer = pl.program_id(1)

    # layer 0: x = prompts + positional_embedding  (folded into the fused kernel)
    @pl.when(layer == 0)
    def _():
        x_scratch[...] = prompts_ref[0] + pos_ref[...]

    x = x_scratch[...]                                          # (L, D)

    # ---- attention branch (heads batched on leading axis, no lane slicing) ----
    h = _layer_norm(x, ln1_w[0], ln1_b[0])
    hb = jnp.broadcast_to(h[None], (H, L, D))                   # hoisted broadcast, once/layer
    q = jnp.einsum("hld,hde->hle", hb, wq[0],
                   preferred_element_type=jnp.float32) + bq[0]  # (H, L, HD)
    k = jnp.einsum("hld,hde->hle", hb, wk[0],
                   preferred_element_type=jnp.float32) + bk[0]
    v = jnp.einsum("hld,hde->hle", hb, wv[0],
                   preferred_element_type=jnp.float32) + bv[0]
    s = jnp.einsum("hqe,hke->hqk", q, k,
                   preferred_element_type=jnp.float32) * SCALE  # (H, L, L)
    s = s + mask_ref[...][None]                                 # causal additive mask
    s = s - jnp.max(s, axis=-1, keepdims=True)                  # stable softmax
    p = jnp.exp(s)
    p = p / jnp.sum(p, axis=-1, keepdims=True)
    a = jnp.einsum("hqk,hke->hqe", p, v,
                   preferred_element_type=jnp.float32)          # (H, L, HD)
    attn = jnp.sum(jnp.einsum("hle,hed->hld", a, wo[0],
                              preferred_element_type=jnp.float32), axis=0) + bo[0]
    x = x + attn

    # ---- MLP branch ----
    h2 = _layer_norm(x, ln2_w[0], ln2_b[0])
    u = jnp.dot(h2, wfc[0], preferred_element_type=jnp.float32) + bfc[0]
    u = u * jax.nn.sigmoid(1.702 * u)                           # QuickGELU (CLIP)
    m = jnp.dot(u, wproj[0], preferred_element_type=jnp.float32) + bproj[0]
    x = x + m

    x_scratch[...] = x

    # last layer: ln_final + EOT-row gather + text_projection, fused here
    @pl.when(layer == pl.num_programs(1) - 1)
    def _():
        i = idx_ref[b]
        ids = jax.lax.broadcasted_iota(jnp.int32, (L, 1), 0)
        sel = (ids == i).astype(jnp.float32)
        row = jnp.sum(sel * x, axis=0, keepdims=True)           # (1, D) EOT row
        hr = _layer_norm(row, lnf_w[...], lnf_b[...])
        out_ref[0] = jnp.dot(hr, proj_ref[...], preferred_element_type=jnp.float32)


# ---------------- wrapper: repack weights + single pallas_call ----------------
def prep_layer_stacks(layers):
    st = lambda key: jnp.stack([ly[key] for ly in layers], axis=0)
    wqkv = st("wqkv").reshape(N_LAYERS, D, 3, H, HD)            # (N, D, 3, H, HD)
    bqkv = st("bqkv").reshape(N_LAYERS, 3, H, HD)               # (N, 3, H, HD)
    return dict(
        ln1_w=st("ln1_w"), ln1_b=st("ln1_b"),
        wq=wqkv[:, :, 0].transpose(0, 2, 1, 3),                 # (N, H, D, HD)
        bq=bqkv[:, 0][:, :, None, :],                           # (N, H, 1, HD)
        wk=wqkv[:, :, 1].transpose(0, 2, 1, 3),
        bk=bqkv[:, 1][:, :, None, :],
        wv=wqkv[:, :, 2].transpose(0, 2, 1, 3),
        bv=bqkv[:, 2][:, :, None, :],
        wo=st("wo").reshape(N_LAYERS, H, HD, D),                # (N, H, HD, D)
        bo=st("bo"),
        ln2_w=st("ln2_w"), ln2_b=st("ln2_b"),
        wfc=st("wfc"), bfc=st("bfc"),
        wproj=st("wproj"), bproj=st("bproj"),
    )


LAYER_KEYS = ["ln1_w", "ln1_b", "wq", "bq", "wk", "bk", "wv", "bv",
              "wo", "bo", "ln2_w", "ln2_b", "wfc", "bfc", "wproj", "bproj"]


def text_encoder_forward(prompts, tokenized_prompts, params):
    eot_idx = jnp.argmax(tokenized_prompts, axis=-1).astype(jnp.int32)
    w = prep_layer_stacks(params["layers"])
    layer_args = [w[k] for k in LAYER_KEYS]

    def full(a):                                   # whole array, resident across grid
        return pl.BlockSpec(a.shape, lambda b, l, idx, nd=a.ndim: (0,) * nd)

    def per_layer(a):                              # stream one layer slice per grid step
        return pl.BlockSpec((1,) + a.shape[1:],
                            lambda b, l, idx, nd=a.ndim: (l,) + (0,) * (nd - 1))

    in_specs = ([pl.BlockSpec((1, L, D), lambda b, l, idx: (b, 0, 0)),     # prompts
                 full(params["pos"]), full(params["mask"])]
                + [per_layer(a) for a in layer_args]
                + [full(params["lnf_w"]), full(params["lnf_b"]), full(params["proj"])])

    out = pl.pallas_call(
        encoder_kernel,
        out_shape=jax.ShapeDtypeStruct((B, 1, E), jnp.float32),
        grid_spec=pltpu.PrefetchScalarGridSpec(
            num_scalar_prefetch=1,
            grid=(B, N_LAYERS),
            in_specs=in_specs,
            out_specs=pl.BlockSpec((1, 1, E), lambda b, l, idx: (b, 0, 0)),
            scratch_shapes=[pltpu.VMEM((L, D), jnp.float32)],
        ),
        compiler_params=pltpu.CompilerParams(
            dimension_semantics=("parallel", "arbitrary")),
    )(eot_idx, prompts, params["pos"], params["mask"], *layer_args,
      params["lnf_w"], params["lnf_b"], params["proj"])
    return out[:, 0, :]                            # (B, E)


# ---------------- pure-JAX reference (for correctness check) ----------------
def reference_forward(prompts, tokenized_prompts, params):
    x = prompts + params["pos"][None]
    for layer in params["layers"]:
        h = _layer_norm(x, layer["ln1_w"][0], layer["ln1_b"][0])
        qkv = h @ layer["wqkv"] + layer["bqkv"][0]
        q, k, v = qkv[..., :D], qkv[..., D:2 * D], qkv[..., 2 * D:]
        q = q.reshape(B, L, H, HD).transpose(0, 2, 1, 3)
        k = k.reshape(B, L, H, HD).transpose(0, 2, 1, 3)
        v = v.reshape(B, L, H, HD).transpose(0, 2, 1, 3)
        s = jnp.einsum("bhqd,bhkd->bhqk", q, k) / math.sqrt(HD) + params["mask"]
        p = jax.nn.softmax(s, axis=-1)
        a = jnp.einsum("bhqk,bhkd->bhqd", p, v).transpose(0, 2, 1, 3).reshape(B, L, D)
        x = x + (a @ layer["wo"] + layer["bo"][0])
        h2 = _layer_norm(x, layer["ln2_w"][0], layer["ln2_b"][0])
        u = h2 @ layer["wfc"] + layer["bfc"][0]
        u = u * jax.nn.sigmoid(1.702 * u)
        x = x + (u @ layer["wproj"] + layer["bproj"][0])
    eot = jnp.argmax(tokenized_prompts, axis=-1)
    x = _layer_norm(x, params["lnf_w"][0], params["lnf_b"][0])
    return x[jnp.arange(B), eot] @ params["proj"]


# ---------------- deterministic parameter / input construction ----------------
def make_params(key):
    keys = iter(jax.random.split(key, 64))
    nrm = lambda shape, s=0.02: (jax.random.normal(next(keys), shape, jnp.float32) * s)
    layers = []
    for _ in range(N_LAYERS):
        layers.append(dict(
            ln1_w=1.0 + nrm((1, D)), ln1_b=nrm((1, D)),
            wqkv=nrm((D, 3 * D)), bqkv=nrm((1, 3 * D)),
            wo=nrm((D, D)), bo=nrm((1, D)),
            ln2_w=1.0 + nrm((1, D)), ln2_b=nrm((1, D)),
            wfc=nrm((D, 4 * D)), bfc=nrm((1, 4 * D)),
            wproj=nrm((4 * D, D)), bproj=nrm((1, D)),
        ))
    # CLIP text causal mask: 0 on/below diagonal, -inf above.
    mask = jnp.where(jnp.triu(jnp.ones((L, L), jnp.bool_), k=1), -jnp.inf, 0.0)
    return dict(
        pos=nrm((L, D), 0.01),
        layers=layers,
        mask=mask.astype(jnp.float32),
        lnf_w=1.0 + nrm((1, D)),
        lnf_b=nrm((1, D)),
        proj=nrm((D, E)),
    )


if __name__ == "__main__":
    key = jax.random.PRNGKey(0)
    kp, kx, kt = jax.random.split(key, 3)
    params = make_params(kp)

    prompts = jax.random.normal(kx, (B, L, D), jnp.float32)           # learned prompt embeddings
    tokenized_prompts = jax.random.randint(kt, (B, L), 1, 100)        # fake token ids
    eot_pos = jnp.array([L - 1, L - 3], dtype=jnp.int32)              # where EOT sits
    tokenized_prompts = tokenized_prompts.at[jnp.arange(B), eot_pos].set(49407)

    out = text_encoder_forward(prompts, tokenized_prompts, params)
    out = jax.block_until_ready(out)

    ref = reference_forward(prompts, tokenized_prompts, params)
    assert out.shape == (B, E)
    assert jnp.allclose(out, ref, atol=1e-4, rtol=1e-4), \
        f"max abs err {jnp.max(jnp.abs(out - ref))}"
    print("KERNEL_OK")
</pallas_src>

<mosaic_0001>
module attributes {stable_mosaic.version = 11 : i64} {
  func.func @encoder_kernel(%arg0: i32, %arg1: i32, %arg2: memref<2xi32, #tpu.memory_space<smem>>, %arg3: memref<1x8x32xf32, #tpu.memory_space<vmem>>, %arg4: memref<8x32xf32, #tpu.memory_space<vmem>>, %arg5: memref<8x8xf32, #tpu.memory_space<vmem>>, %arg6: memref<1x1x32xf32, #tpu.memory_space<vmem>>, %arg7: memref<1x1x32xf32, #tpu.memory_space<vmem>>, %arg8: memref<1x4x32x8xf32, #tpu.memory_space<vmem>>, %arg9: memref<1x4x1x8xf32, #tpu.memory_space<vmem>>, %arg10: memref<1x4x32x8xf32, #tpu.memory_space<vmem>>, %arg11: memref<1x4x1x8xf32, #tpu.memory_space<vmem>>, %arg12: memref<1x4x32x8xf32, #tpu.memory_space<vmem>>, %arg13: memref<1x4x1x8xf32, #tpu.memory_space<vmem>>, %arg14: memref<1x4x8x32xf32, #tpu.memory_space<vmem>>, %arg15: memref<1x1x32xf32, #tpu.memory_space<vmem>>, %arg16: memref<1x1x32xf32, #tpu.memory_space<vmem>>, %arg17: memref<1x1x32xf32, #tpu.memory_space<vmem>>, %arg18: memref<1x32x128xf32, #tpu.memory_space<vmem>>, %arg19: memref<1x1x128xf32, #tpu.memory_space<vmem>>, %arg20: memref<1x128x32xf32, #tpu.memory_space<vmem>>, %arg21: memref<1x1x32xf32, #tpu.memory_space<vmem>>, %arg22: memref<1x32xf32, #tpu.memory_space<vmem>>, %arg23: memref<1x32xf32, #tpu.memory_space<vmem>>, %arg24: memref<32x16xf32, #tpu.memory_space<vmem>>, %arg25: memref<1x1x16xf32, #tpu.memory_space<vmem>>, %arg26: memref<8x32xf32, #tpu.memory_space<vmem>>) attributes {dimension_semantics = [#tpu.dimension_semantics<parallel>, #tpu.dimension_semantics<arbitrary>], iteration_bounds = array<i64: 2, 2>, scalar_prefetch = 1 : i64, scratch_operands = 1 : i64, tpu.core_type = #tpu.core_type<tc>, window_params = [{transform_indices = @transform_0, window_bounds = array<i64: 1, 8, 32>}, {pipeline_mode = #tpu.pipeline_mode<synchronous>, transform_indices = @transform_1, window_bounds = array<i64: 8, 32>}, {pipeline_mode = #tpu.pipeline_mode<synchronous>, transform_indices = @transform_2, window_bounds = array<i64: 8, 8>}, {transform_indices = @transform_3, window_bounds = array<i64: 1, 1, 32>}, {transform_indices = @transform_4, window_bounds = array<i64: 1, 1, 32>}, {transform_indices = @transform_5, window_bounds = array<i64: 1, 4, 32, 8>}, {transform_indices = @transform_6, window_bounds = array<i64: 1, 4, 1, 8>}, {transform_indices = @transform_7, window_bounds = array<i64: 1, 4, 32, 8>}, {transform_indices = @transform_8, window_bounds = array<i64: 1, 4, 1, 8>}, {transform_indices = @transform_9, window_bounds = array<i64: 1, 4, 32, 8>}, {transform_indices = @transform_10, window_bounds = array<i64: 1, 4, 1, 8>}, {transform_indices = @transform_11, window_bounds = array<i64: 1, 4, 8, 32>}, {transform_indices = @transform_12, window_bounds = array<i64: 1, 1, 32>}, {transform_indices = @transform_13, window_bounds = array<i64: 1, 1, 32>}, {transform_indices = @transform_14, window_bounds = array<i64: 1, 1, 32>}, {transform_indices = @transform_15, window_bounds = array<i64: 1, 32, 128>}, {transform_indices = @transform_16, window_bounds = array<i64: 1, 1, 128>}, {transform_indices = @transform_17, window_bounds = array<i64: 1, 128, 32>}, {transform_indices = @transform_18, window_bounds = array<i64: 1, 1, 32>}, {pipeline_mode = #tpu.pipeline_mode<synchronous>, transform_indices = @transform_19, window_bounds = array<i64: 1, 32>}, {pipeline_mode = #tpu.pipeline_mode<synchronous>, transform_indices = @transform_20, window_bounds = array<i64: 1, 32>}, {pipeline_mode = #tpu.pipeline_mode<synchronous>, transform_indices = @transform_21, window_bounds = array<i64: 32, 16>}, {transform_indices = @transform_22, window_bounds = array<i64: 1, 1, 16>}]} {
    %c0_i32 = arith.constant 0 : i32
    %0 = arith.cmpi eq, %arg1, %c0_i32 : i32
    %1 = arith.extui %0 : i1 to i32
    %c0_i32_0 = arith.constant 0 : i32
    %2 = arith.cmpi ne, %1, %c0_i32_0 : i32
    scf.if %2 {
      %c0_85 = arith.constant 0 : index
      %c0_86 = arith.constant 0 : index
      %c0_87 = arith.constant 0 : index
      %133 = vector.load %arg3[%c0_85, %c0_86, %c0_87] : memref<1x8x32xf32, #tpu.memory_space<vmem>>, vector<1x8x32xf32>
      %134 = vector.shape_cast %133 : vector<1x8x32xf32> to vector<8x32xf32>
      %c0_88 = arith.constant 0 : index
      %c0_89 = arith.constant 0 : index
      %135 = vector.load %arg4[%c0_88, %c0_89] : memref<8x32xf32, #tpu.memory_space<vmem>>, vector<8x32xf32>
      %136 = arith.addf %134, %135 : vector<8x32xf32>
      %c0_90 = arith.constant 0 : index
      %c0_91 = arith.constant 0 : index
      %137 = vector.load %arg26[%c0_90, %c0_91] : memref<8x32xf32, #tpu.memory_space<vmem>>, vector<8x32xf32>
      tpu.vector_store %arg26[%c0_90, %c0_91], %136 {strides = array<i32>} : memref<8x32xf32, #tpu.memory_space<vmem>>, vector<8x32xf32>,
    } else {
    }
    %c0 = arith.constant 0 : index
    %c0_1 = arith.constant 0 : index
    %3 = vector.load %arg26[%c0, %c0_1] : memref<8x32xf32, #tpu.memory_space<vmem>>, vector<8x32xf32>
    %c0_2 = arith.constant 0 : index
    %c0_3 = arith.constant 0 : index
    %c0_4 = arith.constant 0 : index
    %4 = vector.load %arg6[%c0_2, %c0_3, %c0_4] : memref<1x1x32xf32, #tpu.memory_space<vmem>>, vector<1x1x32xf32>
    %5 = vector.shape_cast %4 : vector<1x1x32xf32> to vector<1x32xf32>
    %c0_5 = arith.constant 0 : index
    %c0_6 = arith.constant 0 : index
    %c0_7 = arith.constant 0 : index
    %6 = vector.load %arg7[%c0_5, %c0_6, %c0_7] : memref<1x1x32xf32, #tpu.memory_space<vmem>>, vector<1x1x32xf32>
    %7 = vector.shape_cast %6 : vector<1x1x32xf32> to vector<1x32xf32>
    %cst = arith.constant dense<0.000000e+00> : vector<8xf32>
    %8 = vector.multi_reduction <add>, %3, %cst [1] : vector<8x32xf32> to vector<8xf32>
    %9 = vector.shape_cast %8 : vector<8xf32> to vector<8x1xf32>
    %cst_8 = arith.constant 3.200000e+01 : f32
    %10 = vector.broadcast %cst_8 : f32 to vector<8x1xf32>
    %11 = arith.divf %9, %10 : vector<8x1xf32>
    %12 = vector.broadcast %11 : vector<8x1xf32> to vector<8x32xf32>
    %13 = arith.subf %3, %12 : vector<8x32xf32>
    %14 = arith.mulf %13, %13 : vector<8x32xf32>
    %cst_9 = arith.constant dense<0.000000e+00> : vector<8xf32>
    %15 = vector.multi_reduction <add>, %14, %cst_9 [1] : vector<8x32xf32> to vector<8xf32>
    %16 = vector.shape_cast %15 : vector<8xf32> to vector<8x1xf32>
    %cst_10 = arith.constant 3.200000e+01 : f32
    %17 = vector.broadcast %cst_10 : f32 to vector<8x1xf32>
    %18 = arith.divf %16, %17 : vector<8x1xf32>
    %19 = vector.broadcast %11 : vector<8x1xf32> to vector<8x32xf32>
    %20 = arith.subf %3, %19 : vector<8x32xf32>
    %cst_11 = arith.constant 9.99999974E-6 : f32
    %21 = vector.broadcast %cst_11 : f32 to vector<8x1xf32>
    %22 = arith.addf %18, %21 : vector<8x1xf32>
    %23 = math.rsqrt %22 : vector<8x1xf32>
    %24 = vector.broadcast %23 : vector<8x1xf32> to vector<8x32xf32>
    %25 = arith.mulf %20, %24 : vector<8x32xf32>
    %26 = vector.broadcast %5 : vector<1x32xf32> to vector<8x32xf32>
    %27 = arith.mulf %25, %26 : vector<8x32xf32>
    %28 = vector.broadcast %7 : vector<1x32xf32> to vector<8x32xf32>
    %29 = arith.addf %27, %28 : vector<8x32xf32>
    %30 = vector.shape_cast %29 : vector<8x32xf32> to vector<1x8x32xf32>
    %31 = vector.shape_cast %30 : vector<1x8x32xf32> to vector<1x8x32xf32>
    %32 = vector.broadcast %31 : vector<1x8x32xf32> to vector<4x8x32xf32>
    %c0_12 = arith.constant 0 : index
    %c0_13 = arith.constant 0 : index
    %c0_14 = arith.constant 0 : index
    %c0_15 = arith.constant 0 : index
    %33 = vector.load %arg8[%c0_12, %c0_13, %c0_14, %c0_15] : memref<1x4x32x8xf32, #tpu.memory_space<vmem>>, vector<1x4x32x8xf32>
    %34 = vector.shape_cast %33 : vector<1x4x32x8xf32> to vector<4x32x8xf32>
    "tpu.trace_start"() <{level = 10 : i32, message = "hld,hde->hle"}> : () -> ()
    %cst_16 = arith.constant dense<0.000000e+00> : vector<4x8x8xf32>
    %35 = tpu.matmul %32, %34, %cst_16 {dimension_numbers = #tpu.dot_dimension_numbers<[2], [1], [1], [2], [0, 0, 0, 1, 1, 2], [0], [0]>} : vector<4x8x32xf32>, vector<4x32x8xf32>, vector<4x8x8xf32> -> vector<4x8x8xf32>
    "tpu.trace_stop"() : () -> ()
    %c0_17 = arith.constant 0 : index
    %c0_18 = arith.constant 0 : index
    %c0_19 = arith.constant 0 : index
    %c0_20 = arith.constant 0 : index
    %36 = vector.load %arg9[%c0_17, %c0_18, %c0_19, %c0_20] : memref<1x4x1x8xf32, #tpu.memory_space<vmem>>, vector<1x4x1x8xf32>
    %37 = vector.shape_cast %36 : vector<1x4x1x8xf32> to vector<4x1x8xf32>
    %38 = vector.broadcast %37 : vector<4x1x8xf32> to vector<4x8x8xf32>
    %39 = arith.addf %35, %38 : vector<4x8x8xf32>
    %c0_21 = arith.constant 0 : index
    %c0_22 = arith.constant 0 : index
    %c0_23 = arith.constant 0 : index
    %c0_24 = arith.constant 0 : index
    %40 = vector.load %arg10[%c0_21, %c0_22, %c0_23, %c0_24] : memref<1x4x32x8xf32, #tpu.memory_space<vmem>>, vector<1x4x32x8xf32>
    %41 = vector.shape_cast %40 : vector<1x4x32x8xf32> to vector<4x32x8xf32>
    "tpu.trace_start"() <{level = 10 : i32, message = "hld,hde->hle"}> : () -> ()
    %cst_25 = arith.constant dense<0.000000e+00> : vector<4x8x8xf32>
    %42 = tpu.matmul %32, %41, %cst_25 {dimension_numbers = #tpu.dot_dimension_numbers<[2], [1], [1], [2], [0, 0, 0, 1, 1, 2], [0], [0]>} : vector<4x8x32xf32>, vector<4x32x8xf32>, vector<4x8x8xf32> -> vector<4x8x8xf32>
    "tpu.trace_stop"() : () -> ()
    %c0_26 = arith.constant 0 : index
    %c0_27 = arith.constant 0 : index
    %c0_28 = arith.constant 0 : index
    %c0_29 = arith.constant 0 : index
    %43 = vector.load %arg11[%c0_26, %c0_27, %c0_28, %c0_29] : memref<1x4x1x8xf32, #tpu.memory_space<vmem>>, vector<1x4x1x8xf32>
    %44 = vector.shape_cast %43 : vector<1x4x1x8xf32> to vector<4x1x8xf32>
    %45 = vector.broadcast %44 : vector<4x1x8xf32> to vector<4x8x8xf32>
    %46 = arith.addf %42, %45 : vector<4x8x8xf32>
    %c0_30 = arith.constant 0 : index
    %c0_31 = arith.constant 0 : index
    %c0_32 = arith.constant 0 : index
    %c0_33 = arith.constant 0 : index
    %47 = vector.load %arg12[%c0_30, %c0_31, %c0_32, %c0_33] : memref<1x4x32x8xf32, #tpu.memory_space<vmem>>, vector<1x4x32x8xf32>
    %48 = vector.shape_cast %47 : vector<1x4x32x8xf32> to vector<4x32x8xf32>
    "tpu.trace_start"() <{level = 10 : i32, message = "hld,hde->hle"}> : () -> ()
    %cst_34 = arith.constant dense<0.000000e+00> : vector<4x8x8xf32>
    %49 = tpu.matmul %32, %48, %cst_34 {dimension_numbers = #tpu.dot_dimension_numbers<[2], [1], [1], [2], [0, 0, 0, 1, 1, 2], [0], [0]>} : vector<4x8x32xf32>, vector<4x32x8xf32>, vector<4x8x8xf32> -> vector<4x8x8xf32>
    "tpu.trace_stop"() : () -> ()
    %c0_35 = arith.constant 0 : index
    %c0_36 = arith.constant 0 : index
    %c0_37 = arith.constant 0 : index
    %c0_38 = arith.constant 0 : index
    %50 = vector.load %arg13[%c0_35, %c0_36, %c0_37, %c0_38] : memref<1x4x1x8xf32, #tpu.memory_space<vmem>>, vector<1x4x1x8xf32>
    %51 = vector.shape_cast %50 : vector<1x4x1x8xf32> to vector<4x1x8xf32>
    %52 = vector.broadcast %51 : vector<4x1x8xf32> to vector<4x8x8xf32>
    %53 = arith.addf %49, %52 : vector<4x8x8xf32>
    "tpu.trace_start"() <{level = 10 : i32, message = "hqe,hke->hqk"}> : () -> ()
    %cst_39 = arith.constant dense<0.000000e+00> : vector<4x8x8xf32>
    %54 = tpu.matmul %39, %46, %cst_39 {dimension_numbers = #tpu.dot_dimension_numbers<[2], [2], [1], [1], [0, 0, 0, 1, 1, 1], [0], [0]>} : vector<4x8x8xf32>, vector<4x8x8xf32>, vector<4x8x8xf32> -> vector<4x8x8xf32>
    "tpu.trace_stop"() : () -> ()
    %cst_40 = arith.constant 0.353553385 : f32
    %55 = vector.broadcast %cst_40 : f32 to vector<4x8x8xf32>
    %56 = arith.mulf %54, %55 : vector<4x8x8xf32>
    %c0_41 = arith.constant 0 : index
    %c0_42 = arith.constant 0 : index
    %57 = vector.load %arg5[%c0_41, %c0_42] : memref<8x8xf32, #tpu.memory_space<vmem>>, vector<8x8xf32>
    %58 = vector.shape_cast %57 : vector<8x8xf32> to vector<1x8x8xf32>
    %59 = vector.broadcast %58 : vector<1x8x8xf32> to vector<4x8x8xf32>
    %60 = arith.addf %56, %59 : vector<4x8x8xf32>
    %cst_43 = arith.constant dense<0xFF800000> : vector<4x8xf32>
    %61 = vector.multi_reduction <maximumf>, %60, %cst_43 [2] : vector<4x8x8xf32> to vector<4x8xf32>
    %62 = vector.shape_cast %61 : vector<4x8xf32> to vector<4x8x1xf32>
    %63 = vector.broadcast %62 : vector<4x8x1xf32> to vector<4x8x8xf32>
    %64 = arith.subf %60, %63 : vector<4x8x8xf32>
    %65 = math.exp %64 : vector<4x8x8xf32>
    %cst_44 = arith.constant dense<0.000000e+00> : vector<4x8xf32>
    %66 = vector.multi_reduction <add>, %65, %cst_44 [2] : vector<4x8x8xf32> to vector<4x8xf32>
    %67 = vector.shape_cast %66 : vector<4x8xf32> to vector<4x8x1xf32>
    %68 = vector.broadcast %67 : vector<4x8x1xf32> to vector<4x8x8xf32>
    %69 = arith.divf %65, %68 : vector<4x8x8xf32>
    "tpu.trace_start"() <{level = 10 : i32, message = "hqk,hke->hqe"}> : () -> ()
    %cst_45 = arith.constant dense<0.000000e+00> : vector<4x8x8xf32>
    %70 = tpu.matmul %69, %53, %cst_45 {dimension_numbers = #tpu.dot_dimension_numbers<[2], [1], [1], [2], [0, 0, 0, 1, 1, 2], [0], [0]>} : vector<4x8x8xf32>, vector<4x8x8xf32>, vector<4x8x8xf32> -> vector<4x8x8xf32>
    "tpu.trace_stop"() : () -> ()
    %c0_46 = arith.constant 0 : index
    %c0_47 = arith.constant 0 : index
    %c0_48 = arith.constant 0 : index
    %c0_49 = arith.constant 0 : index
    %71 = vector.load %arg14[%c0_46, %c0_47, %c0_48, %c0_49] : memref<1x4x8x32xf32, #tpu.memory_space<vmem>>, vector<1x4x8x32xf32>
    %72 = vector.shape_cast %71 : vector<1x4x8x32xf32> to vector<4x8x32xf32>
    "tpu.trace_start"() <{level = 10 : i32, message = "hle,hed->hld"}> : () -> ()
    %cst_50 = arith.constant dense<0.000000e+00> : vector<4x8x32xf32>
    %73 = tpu.matmul %70, %72, %cst_50 {dimension_numbers = #tpu.dot_dimension_numbers<[2], [1], [1], [2], [0, 0, 0, 1, 1, 2], [0], [0]>} : vector<4x8x8xf32>, vector<4x8x32xf32>, vector<4x8x32xf32> -> vector<4x8x32xf32>
    "tpu.trace_stop"() : () -> ()
    %cst_51 = arith.constant dense<0.000000e+00> : vector<8x32xf32>
    %74 = vector.multi_reduction <add>, %73, %cst_51 [0] : vector<4x8x32xf32> to vector<8x32xf32>
    %c0_52 = arith.constant 0 : index
    %c0_53 = arith.constant 0 : index
    %c0_54 = arith.constant 0 : index
    %75 = vector.load %arg15[%c0_52, %c0_53, %c0_54] : memref<1x1x32xf32, #tpu.memory_space<vmem>>, vector<1x1x32xf32>
    %76 = vector.shape_cast %75 : vector<1x1x32xf32> to vector<1x32xf32>
    %77 = vector.broadcast %76 : vector<1x32xf32> to vector<8x32xf32>
    %78 = arith.addf %74, %77 : vector<8x32xf32>
    %79 = arith.addf %3, %78 : vector<8x32xf32>
    %c0_55 = arith.constant 0 : index
    %c0_56 = arith.constant 0 : index
    %c0_57 = arith.constant 0 : index
    %80 = vector.load %arg16[%c0_55, %c0_56, %c0_57] : memref<1x1x32xf32, #tpu.memory_space<vmem>>, vector<1x1x32xf32>
    %81 = vector.shape_cast %80 : vector<1x1x32xf32> to vector<1x32xf32>
    %c0_58 = arith.constant 0 : index
    %c0_59 = arith.constant 0 : index
    %c0_60 = arith.constant 0 : index
    %82 = vector.load %arg17[%c0_58, %c0_59, %c0_60] : memref<1x1x32xf32, #tpu.memory_space<vmem>>, vector<1x1x32xf32>
    %83 = vector.shape_cast %82 : vector<1x1x32xf32> to vector<1x32xf32>
    %cst_61 = arith.constant dense<0.000000e+00> : vector<8xf32>
    %84 = vector.multi_reduction <add>, %79, %cst_61 [1] : vector<8x32xf32> to vector<8xf32>
    %85 = vector.shape_cast %84 : vector<8xf32> to vector<8x1xf32>
    %cst_62 = arith.constant 3.200000e+01 : f32
    %86 = vector.broadcast %cst_62 : f32 to vector<8x1xf32>
    %87 = arith.divf %85, %86 : vector<8x1xf32>
    %88 = vector.broadcast %87 : vector<8x1xf32> to vector<8x32xf32>
    %89 = arith.subf %79, %88 : vector<8x32xf32>
    %90 = arith.mulf %89, %89 : vector<8x32xf32>
    %cst_63 = arith.constant dense<0.000000e+00> : vector<8xf32>
    %91 = vector.multi_reduction <add>, %90, %cst_63 [1] : vector<8x32xf32> to vector<8xf32>
    %92 = vector.shape_cast %91 : vector<8xf32> to vector<8x1xf32>
    %cst_64 = arith.constant 3.200000e+01 : f32
    %93 = vector.broadcast %cst_64 : f32 to vector<8x1xf32>
    %94 = arith.divf %92, %93 : vector<8x1xf32>
    %95 = vector.broadcast %87 : vector<8x1xf32> to vector<8x32xf32>
    %96 = arith.subf %79, %95 : vector<8x32xf32>
    %cst_65 = arith.constant 9.99999974E-6 : f32
    %97 = vector.broadcast %cst_65 : f32 to vector<8x1xf32>
    %98 = arith.addf %94, %97 : vector<8x1xf32>
    %99 = math.rsqrt %98 : vector<8x1xf32>
    %100 = vector.broadcast %99 : vector<8x1xf32> to vector<8x32xf32>
    %101 = arith.mulf %96, %100 : vector<8x32xf32>
    %102 = vector.broadcast %81 : vector<1x32xf32> to vector<8x32xf32>
    %103 = arith.mulf %101, %102 : vector<8x32xf32>
    %104 = vector.broadcast %83 : vector<1x32xf32> to vector<8x32xf32>
    %105 = arith.addf %103, %104 : vector<8x32xf32>
    %c0_66 = arith.constant 0 : index
    %c0_67 = arith.constant 0 : index
    %c0_68 = arith.constant 0 : index
    %106 = vector.load %arg18[%c0_66, %c0_67, %c0_68] : memref<1x32x128xf32, #tpu.memory_space<vmem>>, vector<1x32x128xf32>
    %107 = vector.shape_cast %106 : vector<1x32x128xf32> to vector<32x128xf32>
    %cst_69 = arith.constant dense<0.000000e+00> : vector<8x128xf32>
    %108 = tpu.matmul %105, %107, %cst_69 {dimension_numbers = #tpu.dot_dimension_numbers<[1], [0], [0], [1], [0, 0, 1, 1], [], []>} : vector<8x32xf32>, vector<32x128xf32>, vector<8x128xf32> -> vector<8x128xf32>
    %c0_70 = arith.constant 0 : index
    %c0_71 = arith.constant 0 : index
    %c0_72 = arith.constant 0 : index
    %109 = vector.load %arg19[%c0_70, %c0_71, %c0_72] : memref<1x1x128xf32, #tpu.memory_space<vmem>>, vector<1x1x128xf32>
    %110 = vector.shape_cast %109 : vector<1x1x128xf32> to vector<1x128xf32>
    %111 = vector.broadcast %110 : vector<1x128xf32> to vector<8x128xf32>
    %112 = arith.addf %108, %111 : vector<8x128xf32>
    %cst_73 = arith.constant 1.702000e+00 : f32
    %113 = vector.broadcast %cst_73 : f32 to vector<8x128xf32>
    %114 = arith.mulf %113, %112 : vector<8x128xf32>
    %115 = arith.negf %114 : vector<8x128xf32>
    %116 = math.exp %115 : vector<8x128xf32>
    %cst_74 = arith.constant 1.000000e+00 : f32
    %117 = vector.broadcast %cst_74 : f32 to vector<8x128xf32>
    %118 = arith.addf %117, %116 : vector<8x128xf32>
    %119 = arith.divf %117, %118 : vector<8x128xf32>
    %120 = arith.mulf %112, %119 : vector<8x128xf32>
    %c0_75 = arith.constant 0 : index
    %c0_76 = arith.constant 0 : index
    %c0_77 = arith.constant 0 : index
    %121 = vector.load %arg20[%c0_75, %c0_76, %c0_77] : memref<1x128x32xf32, #tpu.memory_space<vmem>>, vector<1x128x32xf32>
    %122 = vector.shape_cast %121 : vector<1x128x32xf32> to vector<128x32xf32>
    %cst_78 = arith.constant dense<0.000000e+00> : vector<8x32xf32>
    %123 = tpu.matmul %120, %122, %cst_78 {dimension_numbers = #tpu.dot_dimension_numbers<[1], [0], [0], [1], [0, 0, 1, 1], [], []>} : vector<8x128xf32>, vector<128x32xf32>, vector<8x32xf32> -> vector<8x32xf32>
    %c0_79 = arith.constant 0 : index
    %c0_80 = arith.constant 0 : index
    %c0_81 = arith.constant 0 : index
    %124 = vector.load %arg21[%c0_79, %c0_80, %c0_81] : memref<1x1x32xf32, #tpu.memory_space<vmem>>, vector<1x1x32xf32>
    %125 = vector.shape_cast %124 : vector<1x1x32xf32> to vector<1x32xf32>
    %126 = vector.broadcast %125 : vector<1x32xf32> to vector<8x32xf32>
    %127 = arith.addf %123, %126 : vector<8x32xf32>
    %128 = arith.addf %79, %127 : vector<8x32xf32>
    %c0_82 = arith.constant 0 : index
    %c0_83 = arith.constant 0 : index
    %129 = vector.load %arg26[%c0_82, %c0_83] : memref<8x32xf32, #tpu.memory_space<vmem>>, vector<8x32xf32>
    tpu.vector_store %arg26[%c0_82, %c0_83], %128 {strides = array<i32>} : memref<8x32xf32, #tpu.memory_space<vmem>>, vector<8x32xf32>,
    %c1_i32 = arith.constant 1 : i32
    %130 = arith.cmpi eq, %arg1, %c1_i32 : i32
    %131 = arith.extui %130 : i1 to i32
    %c0_i32_84 = arith.constant 0 : i32
    %132 = arith.cmpi ne, %131, %c0_i32_84 : i32
    scf.if %132 {
      %133 = arith.index_cast %arg0 : i32 to index
      %134 = memref.load %arg2[%133] : memref<2xi32, #tpu.memory_space<smem>>
      %135 = tpu.iota {dimensions = array<i32: 0>} : vector<8x1xi32>
      %136 = vector.broadcast %134 : i32 to vector<8x1xi32>
      %137 = arith.cmpi eq, %135, %136 : vector<8x1xi32>
      %138 = arith.extui %137 : vector<8x1xi1> to vector<8x1xi32>
      %139 = arith.sitofp %138 : vector<8x1xi32> to vector<8x1xf32>
      %140 = vector.broadcast %139 : vector<8x1xf32> to vector<8x32xf32>
      %141 = arith.mulf %140, %128 : vector<8x32xf32>
      %cst_85 = arith.constant dense<0.000000e+00> : vector<32xf32>
      %142 = vector.multi_reduction <add>, %141, %cst_85 [0] : vector<8x32xf32> to vector<32xf32>
      %143 = vector.shape_cast %142 : vector<32xf32> to vector<1x32xf32>
      %c0_86 = arith.constant 0 : index
      %c0_87 = arith.constant 0 : index
      %144 = vector.load %arg22[%c0_86, %c0_87] : memref<1x32xf32, #tpu.memory_space<vmem>>, vector<1x32xf32>
      %c0_88 = arith.constant 0 : index
      %c0_89 = arith.constant 0 : index
      %145 = vector.load %arg23[%c0_88, %c0_89] : memref<1x32xf32, #tpu.memory_space<vmem>>, vector<1x32xf32>
      %cst_90 = arith.constant dense<0.000000e+00> : vector<1xf32>
      %146 = vector.multi_reduction <add>, %143, %cst_90 [1] : vector<1x32xf32> to vector<1xf32>
      %147 = vector.shape_cast %146 : vector<1xf32> to vector<1x1xf32>
      %cst_91 = arith.constant 3.200000e+01 : f32
      %148 = vector.broadcast %cst_91 : f32 to vector<1x1xf32>
      %149 = arith.divf %147, %148 : vector<1x1xf32>
      %150 = vector.broadcast %149 : vector<1x1xf32> to vector<1x32xf32>
      %151 = arith.subf %143, %150 : vector<1x32xf32>
      %152 = arith.mulf %151, %151 : vector<1x32xf32>
      %cst_92 = arith.constant dense<0.000000e+00> : vector<1xf32>
      %153 = vector.multi_reduction <add>, %152, %cst_92 [1] : vector<1x32xf32> to vector<1xf32>
      %154 = vector.shape_cast %153 : vector<1xf32> to vector<1x1xf32>
      %cst_93 = arith.constant 3.200000e+01 : f32
      %155 = vector.broadcast %cst_93 : f32 to vector<1x1xf32>
      %156 = arith.divf %154, %155 : vector<1x1xf32>
      %157 = vector.broadcast %149 : vector<1x1xf32> to vector<1x32xf32>
      %158 = arith.subf %143, %157 : vector<1x32xf32>
      %cst_94 = arith.constant 9.99999974E-6 : f32
      %159 = vector.broadcast %cst_94 : f32 to vector<1x1xf32>
      %160 = arith.addf %156, %159 : vector<1x1xf32>
      %161 = math.rsqrt %160 : vector<1x1xf32>
      %162 = vector.broadcast %161 : vector<1x1xf32> to vector<1x32xf32>
      %163 = arith.mulf %158, %162 : vector<1x32xf32>
      %164 = arith.mulf %163, %144 : vector<1x32xf32>
      %165 = arith.addf %164, %145 : vector<1x32xf32>
      %c0_95 = arith.constant 0 : index
      %c0_96 = arith.constant 0 : index
      %166 = vector.load %arg24[%c0_95, %c0_96] : memref<32x16xf32, #tpu.memory_space<vmem>>, vector<32x16xf32>
      %cst_97 = arith.constant dense<0.000000e+00> : vector<1x16xf32>
      %167 = tpu.matmul %165, %166, %cst_97 {dimension_numbers = #tpu.dot_dimension_numbers<[1], [0], [0], [1], [0, 0, 1, 1], [], []>} : vector<1x32xf32>, vector<32x16xf32>, vector<1x16xf32> -> vector<1x16xf32>
      %c0_98 = arith.constant 0 : index
      %c0_99 = arith.constant 0 : index
      %c0_100 = arith.constant 0 : index
      %168 = vector.load %arg25[%c0_98, %c0_99, %c0_100] : memref<1x1x16xf32, #tpu.memory_space<vmem>>, vector<1x1x16xf32>
      %169 = vector.shape_cast %168 : vector<1x1x16xf32> to vector<1x16xf32>
      %170 = vector.shape_cast %167 : vector<1x16xf32> to vector<1x1x16xf32>
      tpu.vector_store %arg25[%c0_98, %c0_99, %c0_100], %170 {strides = array<i32>} : memref<1x1x16xf32, #tpu.memory_space<vmem>>, vector<1x1x16xf32>,
    } else {
    }
    return
  }
  func.func @transform_0(%arg0: i32, %arg1: i32, %arg2: memref<2xi32, #tpu.memory_space<smem>>) -> (i32, i32, i32) {
    %c0_i32 = arith.constant 0 : i32
    %c0_i32_0 = arith.constant 0 : i32
    %c0_i32_1 = arith.constant 0 : i32
    return %arg0, %c0_i32, %c0_i32_0 : i32, i32, i32
  }
  func.func @transform_1(%arg0: i32, %arg1: i32, %arg2: memref<2xi32, #tpu.memory_space<smem>>) -> (i32, i32) {
    %c0_i32 = arith.constant 0 : i32
    %c0_i32_0 = arith.constant 0 : i32
    %c0_i32_1 = arith.constant 0 : i32
    return %c0_i32, %c0_i32_0 : i32, i32
  }
  func.func @transform_2(%arg0: i32, %arg1: i32, %arg2: memref<2xi32, #tpu.memory_space<smem>>) -> (i32, i32) {
    %c0_i32 = arith.constant 0 : i32
    %c0_i32_0 = arith.constant 0 : i32
    %c0_i32_1 = arith.constant 0 : i32
    return %c0_i32, %c0_i32_0 : i32, i32
  }
  func.func @transform_3(%arg0: i32, %arg1: i32, %arg2: memref<2xi32, #tpu.memory_space<smem>>) -> (i32, i32, i32) {
    %c0_i32 = arith.constant 0 : i32
    %c0_i32_0 = arith.constant 0 : i32
    %c0_i32_1 = arith.constant 0 : i32
    return %arg1, %c0_i32, %c0_i32_0 : i32, i32, i32
  }
  func.func @transform_4(%arg0: i32, %arg1: i32, %arg2: memref<2xi32, #tpu.memory_space<smem>>) -> (i32, i32, i32) {
    %c0_i32 = arith.constant 0 : i32
    %c0_i32_0 = arith.constant 0 : i32
    %c0_i32_1 = arith.constant 0 : i32
    return %arg1, %c0_i32, %c0_i32_0 : i32, i32, i32
  }
  func.func @transform_5(%arg0: i32, %arg1: i32, %arg2: memref<2xi32, #tpu.memory_space<smem>>) -> (i32, i32, i32, i32) {
    %c0_i32 = arith.constant 0 : i32
    %c0_i32_0 = arith.constant 0 : i32
    %c0_i32_1 = arith.constant 0 : i32
    %c0_i32_2 = arith.constant 0 : i32
    return %arg1, %c0_i32, %c0_i32_0, %c0_i32_1 : i32, i32, i32, i32
  }
  func.func @transform_6(%arg0: i32, %arg1: i32, %arg2: memref<2xi32, #tpu.memory_space<smem>>) -> (i32, i32, i32, i32) {
    %c0_i32 = arith.constant 0 : i32
    %c0_i32_0 = arith.constant 0 : i32
    %c0_i32_1 = arith.constant 0 : i32
    %c0_i32_2 = arith.constant 0 : i32
    return %arg1, %c0_i32, %c0_i32_0, %c0_i32_1 : i32, i32, i32, i32
  }
  func.func @transform_7(%arg0: i32, %arg1: i32, %arg2: memref<2xi32, #tpu.memory_space<smem>>) -> (i32, i32, i32, i32) {
    %c0_i32 = arith.constant 0 : i32
    %c0_i32_0 = arith.constant 0 : i32
    %c0_i32_1 = arith.constant 0 : i32
    %c0_i32_2 = arith.constant 0 : i32
    return %arg1, %c0_i32, %c0_i32_0, %c0_i32_1 : i32, i32, i32, i32
  }
  func.func @transform_8(%arg0: i32, %arg1: i32, %arg2: memref<2xi32, #tpu.memory_space<smem>>) -> (i32, i32, i32, i32) {
    %c0_i32 = arith.constant 0 : i32
    %c0_i32_0 = arith.constant 0 : i32
    %c0_i32_1 = arith.constant 0 : i32
    %c0_i32_2 = arith.constant 0 : i32
    return %arg1, %c0_i32, %c0_i32_0, %c0_i32_1 : i32, i32, i32, i32
  }
  func.func @transform_9(%arg0: i32, %arg1: i32, %arg2: memref<2xi32, #tpu.memory_space<smem>>) -> (i32, i32, i32, i32) {
    %c0_i32 = arith.constant 0 : i32
    %c0_i32_0 = arith.constant 0 : i32
    %c0_i32_1 = arith.constant 0 : i32
    %c0_i32_2 = arith.constant 0 : i32
    return %arg1, %c0_i32, %c0_i32_0, %c0_i32_1 : i32, i32, i32, i32
  }
  func.func @transform_10(%arg0: i32, %arg1: i32, %arg2: memref<2xi32, #tpu.memory_space<smem>>) -> (i32, i32, i32, i32) {
    %c0_i32 = arith.constant 0 : i32
    %c0_i32_0 = arith.constant 0 : i32
    %c0_i32_1 = arith.constant 0 : i32
    %c0_i32_2 = arith.constant 0 : i32
    return %arg1, %c0_i32, %c0_i32_0, %c0_i32_1 : i32, i32, i32, i32
  }
  func.func @transform_11(%arg0: i32, %arg1: i32, %arg2: memref<2xi32, #tpu.memory_space<smem>>) -> (i32, i32, i32, i32) {
    %c0_i32 = arith.constant 0 : i32
    %c0_i32_0 = arith.constant 0 : i32
    %c0_i32_1 = arith.constant 0 : i32
    %c0_i32_2 = arith.constant 0 : i32
    return %arg1, %c0_i32, %c0_i32_0, %c0_i32_1 : i32, i32, i32, i32
  }
  func.func @transform_12(%arg0: i32, %arg1: i32, %arg2: memref<2xi32, #tpu.memory_space<smem>>) -> (i32, i32, i32) {
    %c0_i32 = arith.constant 0 : i32
    %c0_i32_0 = arith.constant 0 : i32
    %c0_i32_1 = arith.constant 0 : i32
    return %arg1, %c0_i32, %c0_i32_0 : i32, i32, i32
  }
  func.func @transform_13(%arg0: i32, %arg1: i32, %arg2: memref<2xi32, #tpu.memory_space<smem>>) -> (i32, i32, i32) {
    %c0_i32 = arith.constant 0 : i32
    %c0_i32_0 = arith.constant 0 : i32
    %c0_i32_1 = arith.constant 0 : i32
    return %arg1, %c0_i32, %c0_i32_0 : i32, i32, i32
  }
  func.func @transform_14(%arg0: i32, %arg1: i32, %arg2: memref<2xi32, #tpu.memory_space<smem>>) -> (i32, i32, i32) {
    %c0_i32 = arith.constant 0 : i32
    %c0_i32_0 = arith.constant 0 : i32
    %c0_i32_1 = arith.constant 0 : i32
    return %arg1, %c0_i32, %c0_i32_0 : i32, i32, i32
  }
  func.func @transform_15(%arg0: i32, %arg1: i32, %arg2: memref<2xi32, #tpu.memory_space<smem>>) -> (i32, i32, i32) {
    %c0_i32 = arith.constant 0 : i32
    %c0_i32_0 = arith.constant 0 : i32
    %c0_i32_1 = arith.constant 0 : i32
    return %arg1, %c0_i32, %c0_i32_0 : i32, i32, i32
  }
  func.func @transform_16(%arg0: i32, %arg1: i32, %arg2: memref<2xi32, #tpu.memory_space<smem>>) -> (i32, i32, i32) {
    %c0_i32 = arith.constant 0 : i32
    %c0_i32_0 = arith.constant 0 : i32
    %c0_i32_1 = arith.constant 0 : i32
    return %arg1, %c0_i32, %c0_i32_0 : i32, i32, i32
  }
  func.func @transform_17(%arg0: i32, %arg1: i32, %arg2: memref<2xi32, #tpu.memory_space<smem>>) -> (i32, i32, i32) {
    %c0_i32 = arith.constant 0 : i32
    %c0_i32_0 = arith.constant 0 : i32
    %c0_i32_1 = arith.constant 0 : i32
    return %arg1, %c0_i32, %c0_i32_0 : i32, i32, i32
  }
  func.func @transform_18(%arg0: i32, %arg1: i32, %arg2: memref<2xi32, #tpu.memory_space<smem>>) -> (i32, i32, i32) {
    %c0_i32 = arith.constant 0 : i32
    %c0_i32_0 = arith.constant 0 : i32
    %c0_i32_1 = arith.constant 0 : i32
    return %arg1, %c0_i32, %c0_i32_0 : i32, i32, i32
  }
  func.func @transform_19(%arg0: i32, %arg1: i32, %arg2: memref<2xi32, #tpu.memory_space<smem>>) -> (i32, i32) {
    %c0_i32 = arith.constant 0 : i32
    %c0_i32_0 = arith.constant 0 : i32
    %c0_i32_1 = arith.constant 0 : i32
    return %c0_i32, %c0_i32_0 : i32, i32
  }
  func.func @transform_20(%arg0: i32, %arg1: i32, %arg2: memref<2xi32, #tpu.memory_space<smem>>) -> (i32, i32) {
    %c0_i32 = arith.constant 0 : i32
    %c0_i32_0 = arith.constant 0 : i32
    %c0_i32_1 = arith.constant 0 : i32
    return %c0_i32, %c0_i32_0 : i32, i32
  }
  func.func @transform_21(%arg0: i32, %arg1: i32, %arg2: memref<2xi32, #tpu.memory_space<smem>>) -> (i32, i32) {
    %c0_i32 = arith.constant 0 : i32
    %c0_i32_0 = arith.constant 0 : i32
    %c0_i32_1 = arith.constant 0 : i32
    return %c0_i32, %c0_i32_0 : i32, i32
  }
  func.func @transform_22(%arg0: i32, %arg1: i32, %arg2: memref<2xi32, #tpu.memory_space<smem>>) -> (i32, i32, i32) {
    %c0_i32 = arith.constant 0 : i32
    %c0_i32_0 = arith.constant 0 : i32
    %c0_i32_1 = arith.constant 0 : i32
    return %arg0, %c0_i32, %c0_i32_0 : i32, i32, i32
  }
}

</mosaic_0001>

<bundles_post_ra>
// kernel: tpu_custom_call.1
= control target key start
LH: loop header
LB: loop body
LE: loop exit
PB: predicated region body
PF: predicated region fallthrough
CT: control target
= control target key end

     0   :  { %s4959_s0 = inlined_call_operand.vmem [shape: s32[2], index: 0, kind: input, shape index: {}]   ;;  %s4960_s1 = inlined_call_operand.vmem [shape: f32[2,8,32], index: 1, kind: input, shape index: {}]   ;;  %s4961_s2 = inlined_call_operand.vmem [shape: f32[8,32], index: 2, kind: input, shape index: {}]   ;;  %s4962_s3 = inlined_call_operand.vmem [shape: f32[8,8], index: 3, kind: input, shape index: {}]   ;;  %s4963_s4 = inlined_call_operand.vmem [shape: f32[2,1,32], index: 4, kind: input, shape index: {}]   ;;  %s4964_s5 = inlined_call_operand.vmem [shape: f32[2,1,32], index: 5, kind: input, shape index: {}]   ;;  %s4965_s6 = inlined_call_operand.vmem [shape: f32[2,4,32,8], index: 6, kind: input, shape index: {}]   ;;  %s4966_s7 = inlined_call_operand.vmem [shape: f32[2,4,1,8], index: 7, kind: input, shape index: {}]   ;;  %s4967_s8 = inlined_call_operand.vmem [shape: f32[2,4,32,8], index: 8, kind: input, shape index: {}]   ;;  %s4968_s9 = inlined_call_operand.vmem [shape: f32[2,4,1,8], index: 9, kind: input, shape index: {}]   ;;  %s4969_s10 = inlined_call_operand.vmem [shape: f32[2,4,32,8], index: 10, kind: input, shape index: {}]   ;;  %s4970_s11 = inlined_call_operand.vmem [shape: f32[2,4,1,8], index: 11, kind: input, shape index: {}]   ;;  %s4971_s12 = inlined_call_operand.vmem [shape: f32[2,4,8,32], index: 12, kind: input, shape index: {}]   ;;  %s4972_s13 = inlined_call_operand.vmem [shape: f32[2,1,32], index: 13, kind: input, shape index: {}]   ;;  %s4973_s14 = inlined_call_operand.vmem [shape: f32[2,1,32], index: 14, kind: input, shape index: {}]   ;;  %s4974_s15 = inlined_call_operand.vmem [shape: f32[2,1,32], index: 15, kind: input, shape index: {}]   ;;  %s4975_s16 = inlined_call_operand.vmem [shape: f32[2,32,128], index: 16, kind: input, shape index: {}]   ;;  %s4976_s17 = inlined_call_operand.vmem [shape: f32[2,1,128], index: 17, kind: input, shape index: {}]   ;;  %s4977_s18 = inlined_call_operand.vmem [shape: f32[2,128,32], index: 18, kind: input, shape index: {}]   ;;  %s4978_s19 = inlined_call_operand.vmem [shape: f32[2,1,32], index: 19, kind: input, shape index: {}]   ;;  %s4979_s20 = inlined_call_operand.vmem [shape: f32[1,32], index: 20, kind: input, shape index: {}]   ;;  %s4980_s21 = inlined_call_operand.vmem [shape: f32[1,32], index: 21, kind: input, shape index: {}]   ;;  %s4981_s22 = inlined_call_operand.vmem [shape: f32[32,16], index: 22, kind: input, shape index: {}]   ;;  %s4982_s23 = inlined_call_operand.hbm [shape: f32[2,1,16], index: 23, kind: output, shape index: {}]  }
   0x1   :  { %5000 = sst [smem:[#allocation24_spill]] %s4959_s0 }
   0x2   :  { %5001 = sst [smem:[#allocation25_spill]] %s4960_s1  ;;  %s5019_s24 = sld [smem:[#allocation24_spill]] }
   0x3   :  { %5002 = sst [smem:[#allocation26_spill]] %s4961_s2 }
   0x4   :  { %5003 = sst [smem:[#allocation27_spill]] %s4962_s3 }
   0x5   :  { %5004 = sst [smem:[#allocation28_spill]] %s4963_s4 }
   0x6   :  { %5005 = sst [smem:[#allocation29_spill]] %s4964_s5 }
   0x7   :  { %5006 = sst [smem:[#allocation30_spill]] %s4965_s6 }
   0x8   :  { %5007 = sst [smem:[#allocation31_spill]] %s4966_s7 }
   0x9   :  { %5008 = sst [smem:[#allocation32_spill]] %s4967_s8 }
   0xa   :  { %5009 = sst [smem:[#allocation33_spill]] %s4968_s9 }
   0xb   :  { %5010 = sst [smem:[#allocation34_spill]] %s4969_s10 }
   0xc   :  { %5011 = sst [smem:[#allocation35_spill]] %s4970_s11 }
   0xd   :  { %5012 = sst [smem:[#allocation36_spill]] %s4971_s12 }
   0xe   :  { %5013 = sst [smem:[#allocation37_spill]] %s4976_s17  ;;  %s28_s17 = sshll.u32 %s5019_s24, 4  ;;  %s29_s17 = int_to_ptr.vmem [resolvable:$true] %s28_s17 }
   0xf   :  { %5014 = sst [smem:[#allocation38_spill]] %s4978_s19  ;;  %s4180_s25 = scalar_lea.vmem %s29_s17, 16 }
  0x10   :  { %5015 = sst [smem:[#allocation39_spill]] %s4979_s20  ;;  %p4181_p0 = scmp.ne.s32.totalorder %s29_s17, %s4180_s25 }
  0x11   :  { %5016 = sst [smem:[#allocation40_spill]] %s4980_s21  ;;  %p4185_p1 = scmp.lt.s32.totalorder %s29_s17, %s29_s17 }
  0x12   :  { %5017 = sst [smem:[#allocation41_spill]] %s4981_s22  ;;  %p4186_p2 = scmp.lt.s32.totalorder %s4180_s25, %s4180_s25 }
  0x13   :  { %5018 = sst [smem:[#allocation42_spill]] %s4982_s23 }
  0x14   :  { %p4187_p3 = por %p4186_p2, %p4185_p1 }
  0x16   :  { %p4188_p4 = pnand %p4187_p3, %p4181_p0 }
  0x18   :  { %4191 = shalt.err (!%p4188_p4)  }
  0x19   :  { %s4290_s5 = smov [#allocation4]  }
  0x1a   :  { %31 = dma.vmem_to_smem %s29_s17, 16, %s4290_s5, [#allocation3] }
  0x1b   :  { %4252 = dma.done.wait [#allocation3], 16 }
  0x1c   :  { %4253 = vsyncadd [#allocation3], 4294967280 }
  0x1d   :  { %33 = sfence }
  0x1e   :  { %34 = vsyncpa [#allocation6], 0 }
  0x1f   :  { %36 = vsyncpa [#allocation6 + $0x1], 0  ;;  %s4421_s1 = smov 0   ;;  %s4423_s26 = smov 0  }
  0x20   :  { %s4425_s2 = smov 0   ;;  %s4427_s6 = smov 0  }
  0x21   :  { %s4429_s27 = smov 0   ;;  %s4431_s7 = smov 0  }
  0x22   :  { %s4433_s28 = smov 0   ;;  %s4435_s17 = smov 0  }
  0x23 LB: > { %5020 = sst [smem:[#allocation9_spill]] %s4260_s1  ;;  %s3525_s29 = sadd.s32 4294967295, %s4288_s17   ;;  %s4288_s17 = sphi %s4435_s17, %s42_s17   ;;  %s4284_s28 = sphi %s4433_s28, %s5083_s28   ;;  %s4280_s7 = sphi %s4431_s7, %s5082_s7   ;;  %s4276_s27 = sphi %s4429_s27, %s5081_s27   ;;  %s4272_s6 = sphi %s4427_s6, %s5080_s6   ;;  %s4268_s2 = sphi %s4425_s2, %s5079_s2   ;;  %s4264_s26 = sphi %s4423_s26, %s5085_s26   ;;  %s4260_s1 = sphi %s4421_s1, %s5084_s1  }
  0x24   : > { %5021 = sst [smem:[#allocation10_spill]] %s4268_s2  ;;  %s3526_s3 = sadd.s32 4294967294, %s4288_s17  }
  0x25   : > { %5022 = sst [smem:[#allocation11_spill]] %s4272_s6  ;;  %s51_s0 = sadd.s32 1, %s4280_s7 }
  0x26   : > { %5023 = sst [smem:[#allocation12_spill]] %s4276_s27  ;;  %p52_p5 = scmp.ge.s32.totalorder %s51_s0, 2 }
  0x27   : > { %5024 = sst [smem:[#allocation13_spill]] %s4280_s7  ;;  %s54_s4 = sadd.s32 1, %s4284_s28 }
  0x28   : > { %5025 = sst [smem:[#allocation14_spill]] %s4284_s28  ;;  %p618_p6 = scmp.ne.s32.totalorder %s4268_s2, %s4264_s26 }
  0x29   : > { %5026 = sst [smem:[#allocation15_spill]] %s4288_s17  ;;  %p619_p7 = scmp.eq.s32.totalorder %s3525_s29, 3 }
  0x2a   : > { %s5087_s0 = smov (%p52_p5, %s51_s0), 0  ;;  %s5089_s4 = smov (!%p52_p5, %s54_s4), %s4284_s28 }
  0x2b   : > { %5027 = sst [smem:[#allocation16_spill]] %s5087_s0  ;;  %p4470_p8 = por %p619_p7, %p618_p6 }
  0x2c   : > { %p624_p9 = scmp.ne.s32.totalorder %s4264_s26, %s4260_s1  ;;  %p56_p10 = scmp.ge.s32.totalorder %s5089_s4, 2 }
  0x2d   : > { %s5028_s30 = scalar_select %p4470_p8, 1, 0 }
  0x2e   : > { %p625_p11 = scmp.eq.s32.totalorder %s3526_s3, 3  ;;  %p3529_p12 = scmp.ge.s32.totalorder %s4288_s17, 1 }
  0x2f   : > { %5029 = sst [smem:[#allocation17_spill]] %s5028_s30  ;;  %p776_p13 = scmp.lt.s32.totalorder %s4288_s17, 5 }
  0x30   : > { %s5091_s4 = smov (%p56_p10, %s5089_s4), 0  ;;  %p4480_p0 = por %p625_p11, %p624_p9 }
  0x31   : > { %5030 = sst [smem:[#allocation18_spill]] %s5091_s4  ;;  %p777_p1 = pnand %p3529_p12, %p776_p13 }
  0x32   : > { %s5031_s24 = scalar_select %p4480_p0, 1, 0 }
  0x33   : > { %s605_s25 = ssub.s32 %s4284_s28, %s5091_s4  ;;  %s608_s5 = sadd.s32 1, %s4268_s2 }
  0x34   : > { %5032 = sst [smem:[#allocation19_spill]] %s5031_s24  ;;  %p606_p2 = scmp.eq.s32.totalorder %s605_s25, 0 }
  0x35   : > { %780 = sbr.rel (%p777_p1) target bundleno = 2963 (0xb93), region = 108 }
  0x36   : > { %s4488_s29 = scalar_select %p606_p2, %s4268_s2, %s608_s5  }
  0x38   : > { %5033 = sst [smem:[#allocation20_spill]] %s4488_s29 }
  0x3c   : > { %p899_p3 = scmp.lt.s32.totalorder %s4276_s27, 1  ;;  %p903_p4 = scmp.lt.s32.totalorder %s4272_s6, 1 }
  0x3d   : > { %s5034_s28 = sld [smem:[#allocation25_spill]]  ;;  %s5040_s8 = sld [smem:[#allocation32_spill]] }
  0x3e   : > { %s900_s0 = scalar_select %p899_p3, %s4276_s27, 1 }
  0x3f   : > { %s4495_s7 = scalar_select %p903_p4, %s4272_s6, 1 }
  0x40   : > { %s3530_s25 = sshll.u32 %s900_s0, 3  ;;  %s5037_s6 = sld [smem:[#allocation30_spill]] }
  0x41   : > { %s3602_s20 = sshll.u32 %s4495_s7, 7  ;;  %s3533_s4 = sshll.u32 %s4495_s7, 2 }
  0x42   : > { %s5041_s9 = sld [smem:[#allocation33_spill]]  ;;  %s5042_s10 = sld [smem:[#allocation34_spill]] }
  0x43   : > { %s902_s29 = scalar_lea.vmem %s5034_s28, %s3530_s25  ;;  %s5038_s25 = sld [smem:[#allocation31_spill]] }
  0x44   : > { %s4523_s23 = scalar_lea.vmem %s5040_s8, %s3602_s20  ;;  %s5043_s11 = sld [smem:[#allocation35_spill]] }
  0x45   : > { %s3605_s28 = sshll.u32 %s4495_s7, 5  ;;  %s5045_s12 = sld [smem:[#allocation36_spill]] }
  0x46   : > { %s4512_s0 = scalar_lea.vmem %s5037_s6, %s3602_s20  ;;  %s4570_s17 = scalar_lea.vmem %s4977_s18, %s3602_s20 }
  0x47   : > { %s5048_s22 = sld [smem:[#allocation38_spill]]  ;;  %s5050_s21 = sld [smem:[#allocation11_spill]] }
  0x48   : > { %s4528_s3 = scalar_lea.vmem %s5041_s9, %s3533_s4  ;;  %s4533_s27 = scalar_lea.vmem %s5042_s10, %s3602_s20 }
  0x49   : > { %s4518_s19 = scalar_lea.vmem %s5038_s25, %s3533_s4  ;;  %s5049_s10 = sand.u32 1, %s4264_s26  }
  0x4a   : > { %5039 = sst [smem:[#allocation21_spill]] %s4518_s19  ;;  %s4538_s5 = scalar_lea.vmem %s5043_s11, %s3533_s4 }
  0x4b   : > { %5044 = sst [smem:[#allocation22_spill]] %s4538_s5  ;;  %s4544_s24 = scalar_lea.vmem %s5045_s12, %s3605_s28 }
  0x4c   : > { %5046 = sst [smem:[#allocation23_spill]] %s4544_s24  ;;  %s4561_s11 = scalar_lea.vmem %s4975_s16, %s3605_s28 }
  0x4d   : > { %s5047_s12 = sld [smem:[#allocation37_spill]]  ;;  %s965_s30 = scalar_lea.vmem %s5048_s22, %s4495_s7 }
  0x4e   : > { %s4578_s6 = scalar_lea.vmem [#allocation5], %s5049_s10  ;;  %p3546_p5 = scmp.ne.s32.totalorder %s5050_s21, 0 }
  0x4f   : > { %v970_v0 = vld [vmem:[%s902_s29] sm:$0xff] (!%p3546_p5)  ;;  %s5051_s4 = sld [smem:[#allocation26_spill]] (!%p3546_p5)  ;;  %vm973_vm0 = vcmask (!%p3546_p5), 261120  }
  0x50   : > { %969 = sbr.rel (%p3546_p5) target bundleno = 89 (0x59), region = 112 }
  0x53   : > { %s957_s24 = scalar_lea.vmem %s5047_s12, %s4495_s7 }
  0x55   : > { %v971_v1 = vld [vmem:[%s5051_s4] sm:$0xff] (!%p3546_p5) }
  0x56   : > { %v972_v2 = vadd.f32 (!%p3546_p5), %v971_v1, %v970_v0 }
  0x58   : > { %974 = vst.msk [vmem:[#allocation2] sm:$0xff] %vm973_vm0, %v972_v2 }
  0x59 PF: > { %vm978_vm1 = vcmask 261120   ;;  %v1007_v10 = vld [vmem:[%s4512_s0] sm:$0xff]  ;;  %v1008_v11 = vld [vmem:[%s4512_s0 + $0x8] sm:$0xff]  ;;  %v4291_v15 = vmov 0.0|0.0   ;;  %v1009_v17 = vld [vmem:[%s4512_s0 + $0x10] sm:$0xff]  ;;  %vm4292_vm2 = vmmov 0   ;;  %s5060_s28 = scalar_lea.vmem %s4972_s13, %s4495_s7  ;;  %s5061_s12 = scalar_lea.vmem %s4973_s14, %s4495_s7 }
  0x5a   : > { %v1019_v12 = vld [vmem:[%s4512_s0 + $0x60] sm:$0xff]  ;;  %v3969_v13 = vpack.c.bf16 %v1008_v11, %v1007_v10  ;;  %v1020_v14 = vld [vmem:[%s4512_s0 + $0x68] sm:$0xff]  ;;  %3968 = vmatprep.subr.bf16.mxu0 %v4291_v15  ;;  %3986 = vmatprep.subr.bf16.mxu1 %v4291_v15  ;;  %v1010_v18 = vld [vmem:[%s4512_s0 + $0x18] sm:$0xff]  ;;  %v4293_v23 = vmov 0.0   ;;  %s5052_s29 = sld [smem:[#allocation28_spill]]  ;;  %s5054_s25 = sld [smem:[#allocation29_spill]] }
  0x5b   : > { %v3987_v16 = vpack.c.bf16 %v1020_v14, %v1019_v12  ;;  %v1021_v19 = vld [vmem:[%s4512_s0 + $0x70] sm:$0xff]  ;;  %v3972_v20 = vpack.c.bf16 %v1010_v18, %v1009_v17  ;;  %v1022_v21 = vld [vmem:[%s4512_s0 + $0x78] sm:$0xff]  ;;  %3727 = vmatprep.mubr.msk.f32.mxu0 %vm4292_vm2, %v4293_v23  ;;  %3760 = vmatprep.mubr.msk.f32.mxu1 %vm4292_vm2, %v4293_v23  ;;  %v1011_v29 = vld [vmem:[%s4512_s0 + $0x20] sm:$0xff]  ;;  %vm1982_vm3 = vcmask 64512   ;;  %s5058_s8 = sld [smem:[#allocation27_spill]]  ;;  %s5059_s9 = sld [smem:[#allocation23_spill]] }
  0x5c   : > { %3970 = vmatpush3.bf16.msra.mxu0 %v3969_v13  ;;  %v3990_v22 = vpack.c.bf16 %v1022_v21, %v1021_v19  ;;  %v1012_v31 = vld [vmem:[%s4512_s0 + $0x28] sm:$0xff]  ;;  %v1338_v32 = vld [vmem:[%s4523_s23 + $0x20] sm:$0xff]  ;;  %v1013_v38 = vld [vmem:[%s4512_s0 + $0x30] sm:$0xff] }
  0x5d   : > { %3988 = vmatpush3.bf16.msra.mxu1 %v3987_v16  ;;  %3971 = vmatprep.subr.bf16.mxu0 %v4291_v15  ;;  %v1339_v33 = vld [vmem:[%s4523_s23 + $0x28] sm:$0xff]  ;;  %v3975_v36 = vpack.c.bf16 %v1012_v31, %v1011_v29  ;;  %v1014_v40 = vld [vmem:[%s4512_s0 + $0x38] sm:$0xff]  ;;  %v1340_v41 = vld [vmem:[%s4523_s23 + $0x30] sm:$0xff] }
  0x5e   : > { %3989 = vmatprep.subr.bf16.mxu1 %v4291_v15  ;;  %v3999_v37 = vpack.c.bf16 %v1339_v33, %v1338_v32  ;;  %v1341_v42 = vld [vmem:[%s4523_s23 + $0x38] sm:$0xff]  ;;  %v3978_v43 = vpack.c.bf16 %v1014_v40, %v1013_v38  ;;  %v1015_v45 = vld [vmem:[%s4512_s0 + $0x40] sm:$0xff]  ;;  %v1016_v46 = vld [vmem:[%s4512_s0 + $0x48] sm:$0xff] }
  0x5f   : > { %v4584_v3 = vld [vmem:[#allocation2] sm:$0xff]  ;;  %v4002_v44 = vpack.c.bf16 %v1341_v42, %v1340_v41  ;;  %v1347_v48 = vld [vmem:[%s4523_s23 + $0x68] sm:$0xff]  ;;  %v3981_v49 = vpack.c.bf16 %v1016_v46, %v1015_v45  ;;  %v1017_v51 = vld [vmem:[%s4512_s0 + $0x50] sm:$0xff] }
  0x60   : > { %v979_v4 = vsel %vm978_vm1, %v4584_v3, 0.0  ;;  %3973 = vmatpush3.bf16.msra.mxu0 %v3972_v20  ;;  %s5053_s5 = scalar_lea.vmem %s5052_s29, %s4495_s7  ;;  %s5055_s2 = scalar_lea.vmem %s5054_s25, %s4495_s7  ;;  %v1346_v47 = vld [vmem:[%s4523_s23 + $0x60] sm:$0xff]  ;;  %v1018_v52 = vld [vmem:[%s4512_s0 + $0x58] sm:$0xff]  ;;  %v1348_v53 = vld [vmem:[%s4523_s23 + $0x70] sm:$0xff] }
  0x61   : > { %980 = vadd.xlane.f32.xlu0 %v979_v4  ;;  %3991 = vmatpush3.bf16.msra.mxu1 %v3990_v22  ;;  %v3547_v28 = vld [vmem:[%s5053_s5] ss:$0 sm:$0xff]  ;;  %v4011_v50 = vpack.c.bf16 %v1347_v48, %v1346_v47  ;;  %v1349_v54 = vld [vmem:[%s4523_s23 + $0x78] sm:$0xff]  ;;  %v3984_v55 = vpack.c.bf16 %v1018_v52, %v1017_v51  ;;  %v1335_v58 = vld [vmem:[%s4523_s23 + $0x8] sm:$0xff]  ;;  %s5056_s0 = sld [smem:[#allocation21_spill]] }
  0x62   : > { %3974 = vmatprep.subr.bf16.mxu0 %v4291_v15  ;;  %3998 = vmatprep.subr.bf16.mxu1 %v4291_v15  ;;  %v3548_v34 = vld [vmem:[%s5055_s2] ss:$0 sm:$0xff]  ;;  %v4014_v56 = vpack.c.bf16 %v1349_v54, %v1348_v53  ;;  %v1663_v60 = vld [vmem:[%s4533_s27 + $0x28] sm:$0xff]  ;;  %v1336_v63 = vld [vmem:[%s4523_s23 + $0x10] sm:$0xff] }
  0x63   : > { %v1334_v57 = vld [vmem:[%s4523_s23] sm:$0xff]  ;;  %v1337_v0 = vld [vmem:[%s4523_s23 + $0x18] sm:$0xff]  ;;  %v1664_v1 = vld [vmem:[%s4533_s27 + $0x30] sm:$0xff] }
  0x64   : > { %v1662_v59 = vld [vmem:[%s4533_s27 + $0x20] sm:$0xff]  ;;  %v3993_v61 = vpack.c.bf16 %v1335_v58, %v1334_v57  ;;  %v1665_v2 = vld [vmem:[%s4533_s27 + $0x38] sm:$0xff]  ;;  %v3996_v4 = vpack.c.bf16 %v1337_v0, %v1336_v63  ;;  %v1344_v12 = vld [vmem:[%s4523_s23 + $0x50] sm:$0xff] }
  0x65   : > { %v4023_v62 = vpack.c.bf16 %v1663_v60, %v1662_v59  ;;  %v1345_v13 = vld [vmem:[%s4523_s23 + $0x58] sm:$0xff]  ;;  %v1672_v14 = vld [vmem:[%s4533_s27 + $0x70] sm:$0xff]  ;;  %v1658_v19 = vld [vmem:[%s4533_s27] sm:$0xff] }
  0x66   : > { %v1673_v16 = vld [vmem:[%s4533_s27 + $0x78] sm:$0xff]  ;;  %v4008_v17 = vpack.c.bf16 %v1345_v13, %v1344_v12  ;;  %v1659_v20 = vld [vmem:[%s4533_s27 + $0x8] sm:$0xff]  ;;  %v1660_v22 = vld [vmem:[%s4533_s27 + $0x10] sm:$0xff] }
  0x67   : > { %v4038_v18 = vpack.c.bf16 %v1673_v16, %v1672_v14  ;;  %v4017_v21 = vpack.c.bf16 %v1659_v20, %v1658_v19  ;;  %v1668_v29 = vld [vmem:[%s4533_s27 + $0x50] sm:$0xff]  ;;  %v3560_v41 = vld [vmem:[%s4528_s3 + $0x3] ss:$0 sm:$0xff]  ;;  %v3557_v48 = vld [vmem:[%s4528_s3] ss:$0 sm:$0xff] }
  0x68   : > { %v3549_v52 = vld [vmem:[%s5056_s0] ss:$0 sm:$0xff]  ;;  %v3558_v57 = vld [vmem:[%s4528_s3 + $0x1] ss:$0 sm:$0xff] }
  0x69   : > { %v3550_v59 = vld [vmem:[%s5056_s0 + $0x1] ss:$0 sm:$0xff] }
  0x6a   : > { %v2291_v19 = vld [vmem:[%s5058_s8] sm:$0xff] }
  0xee   : > { %v981_v5 = vpop.xlane.xlu0 %980 }
  0xef   : > { %v983_v6 = vmul.f32 0.03125, %v981_v5  ;;  %v4026_v5 = vpack.c.bf16 %v1665_v2, %v1664_v1  ;;  %v3551_v1 = vld [vmem:[%s5056_s0 + $0x2] ss:$0 sm:$0xff] }
  0xf1   : > { %v984_v7 = vsub.f32 %v4584_v3, %v983_v6  ;;  %v1342_v6 = vld [vmem:[%s4523_s23 + $0x40] sm:$0xff] }
  0xf3   : > { %v985_v8 = vmul.f32 %v984_v7, %v984_v7 }
  0xf5   : > { %v986_v9 = vsel %vm978_vm1, %v985_v8, 0.0  ;;  %v1670_v8 = vld [vmem:[%s4533_s27 + $0x60] sm:$0xff] }
  0xf6   : > { %987 = vadd.xlane.f32.xlu0 %v986_v9  ;;  %v1671_v9 = vld [vmem:[%s4533_s27 + $0x68] sm:$0xff] }
  0xf7   : > { %v4035_v11 = vpack.c.bf16 %v1671_v9, %v1670_v8 }
 0x183   : > { %v988_v24 = vpop.xlane.xlu0 %987 }
 0x184   : > { %v989_v25 = vmul.f32 0.03125, %v988_v24  ;;  %v1661_v24 = vld [vmem:[%s4533_s27 + $0x18] sm:$0xff] }
 0x186   : > { %v990_v26 = vadd.f32 1e-05, %v989_v25  ;;  %v4020_v25 = vpack.c.bf16 %v1661_v24, %v1660_v22 }
 0x188   : > { %4154 = vrsqrt.f32 %v990_v26  ;;  %v1666_v26 = vld [vmem:[%s4533_s27 + $0x40] sm:$0xff] }
 0x192   : > { %v4155_v27 = vpop.eup %4154 }
 0x193   : > { %v992_v30 = vmul.f32 %v4155_v27, %v984_v7  ;;  %v1343_v7 = vld [vmem:[%s4523_s23 + $0x48] sm:$0xff]  ;;  %s5057_s23 = sld [smem:[#allocation22_spill]] }
 0x194   : > { %v4005_v10 = vpack.c.bf16 %v1343_v7, %v1342_v6  ;;  %v1667_v27 = vld [vmem:[%s4533_s27 + $0x48] sm:$0xff] }
 0x195   : > { %v999_v35 = vmul.f32 %v3547_v28, %v992_v30  ;;  %v4029_v28 = vpack.c.bf16 %v1667_v27, %v1666_v26  ;;  %v1669_v30 = vld [vmem:[%s4533_s27 + $0x58] sm:$0xff] }
 0x196   : > { %v4032_v31 = vpack.c.bf16 %v1669_v30, %v1668_v29 }
 0x197   : > { %v4623_v39 = vadd.f32 %v3548_v34, %v999_v35 }
 0x199   : > { %3728 = vmatmul.mubr.msk.f32.vlgmr.msra.gmra.mrb[0].mxu0 %vm978_vm1, %v4623_v39  ;;  %3761 = vmatmul.mubr.msk.f32.vlgmr.msra.gmra.mrb[0].mxu1 %vm978_vm1, %v4623_v39  ;;  %v3565_v7 = vld [vmem:[%s5057_s23] ss:$0 sm:$0xff] }
 0x19a   : > { %3976 = vmatpush3.bf16.msra.mxu0 %v3975_v36  ;;  %4000 = vmatpush3.bf16.msra.mxu1 %v3999_v37 }
 0x19b   : > { %3977 = vmatprep.subr.bf16.mxu0 %v4291_v15  ;;  %4001 = vmatprep.subr.bf16.mxu1 %v4291_v15 }
 0x19c   : > { %3738 = vmatprep.mubr.msk.f32.mxu0 %vm4292_vm2, %v4293_v23  ;;  %3782 = vmatprep.mubr.msk.f32.mxu1 %vm4292_vm2, %v4293_v23 }
 0x19e   : > { %3979 = vmatpush3.bf16.msra.mxu0 %v3978_v43  ;;  %4003 = vmatpush3.bf16.msra.mxu1 %v4002_v44  ;;  %v3552_v44 = vld [vmem:[%s5056_s0 + $0x3] ss:$0 sm:$0xff] }
 0x19f   : > { %3980 = vmatprep.subr.bf16.mxu0 %v4291_v15  ;;  %4010 = vmatprep.subr.bf16.mxu1 %v4291_v15 }
 0x1a1   : > { %3739 = vmatmul.mubr.msk.f32.vlgmr.msra.gmra.mrb[2].mxu0 %vm978_vm1, %v4623_v39  ;;  %3783 = vmatmul.mubr.msk.f32.vlgmr.msra.gmra.mrb[2].mxu1 %vm978_vm1, %v4623_v39 }
 0x1a2   : > { %3982 = vmatpush3.bf16.msra.mxu0 %v3981_v49  ;;  %4012 = vmatpush3.bf16.msra.mxu1 %v4011_v50  ;;  %v3566_v49 = vld [vmem:[%s5057_s23 + $0x1] ss:$0 sm:$0xff] }
 0x1a3   : > { %3983 = vmatprep.subr.bf16.mxu0 %v4291_v15  ;;  %4013 = vmatprep.subr.bf16.mxu1 %v4291_v15 }
 0x1a4   : > { %3749 = vmatprep.mubr.msk.f32.mxu0 %vm4292_vm2, %v4293_v23  ;;  %3804 = vmatprep.mubr.msk.f32.mxu1 %vm4292_vm2, %v4293_v23 }
 0x1a6   : > { %3985 = vmatpush3.bf16.msra.mxu0 %v3984_v55  ;;  %4015 = vmatpush3.bf16.msra.mxu1 %v4014_v56 }
 0x1a7   : > { %3992 = vmatprep.subr.bf16.mxu0 %v4291_v15  ;;  %4022 = vmatprep.subr.bf16.mxu1 %v4291_v15 }
 0x1a9   : > { %3750 = vmatmul.mubr.msk.f32.vlgmr.msra.gmra.mrb[4].mxu0 %vm978_vm1, %v4623_v39  ;;  %3805 = vmatmul.mubr.msk.f32.vlgmr.msra.gmra.mrb[4].mxu1 %vm978_vm1, %v4623_v39 }
 0x1aa   : > { %3994 = vmatpush3.bf16.msra.mxu0 %v3993_v61  ;;  %4024 = vmatpush3.bf16.msra.mxu1 %v4023_v62  ;;  %v3559_v61 = vld [vmem:[%s4528_s3 + $0x2] ss:$0 sm:$0xff] }
 0x1ab   : > { %3995 = vmatprep.subr.bf16.mxu0 %v4291_v15  ;;  %4025 = vmatprep.subr.bf16.mxu1 %v4291_v15 }
 0x1ac   : > { %3771 = vmatprep.mubr.msk.f32.mxu0 %vm4292_vm2, %v4293_v23  ;;  %3826 = vmatprep.mubr.msk.f32.mxu1 %vm4292_vm2, %v4293_v23 }
 0x1ae   : > { %3997 = vmatpush3.bf16.msra.mxu0 %v3996_v4  ;;  %4027 = vmatpush3.bf16.msra.mxu1 %v4026_v5 }
 0x1af   : > { %4004 = vmatprep.subr.bf16.mxu0 %v4291_v15  ;;  %4034 = vmatprep.subr.bf16.mxu1 %v4291_v15 }
 0x1b1   : > { %3772 = vmatmul.mubr.msk.f32.vlgmr.msra.gmra.mrb[6].mxu0 %vm978_vm1, %v4623_v39  ;;  %3827 = vmatmul.mubr.msk.f32.vlgmr.msra.gmra.mrb[6].mxu1 %vm978_vm1, %v4623_v39 }
 0x1b2   : > { %4006 = vmatpush3.bf16.msra.mxu0 %v4005_v10  ;;  %4036 = vmatpush3.bf16.msra.mxu1 %v4035_v11 }
 0x1b3   : > { %4007 = vmatprep.subr.bf16.mxu0 %v4291_v15  ;;  %4037 = vmatprep.subr.bf16.mxu1 %v4291_v15 }
 0x1b4   : > { %3793 = vmatprep.mubr.msk.f32.mxu0 %vm4292_vm2, %v4293_v23  ;;  %3848 = vmatprep.mubr.msk.f32.mxu1 %vm4292_vm2, %v4293_v23 }
 0x1b6   : > { %4009 = vmatpush3.bf16.msra.mxu0 %v4008_v17  ;;  %4039 = vmatpush3.bf16.msra.mxu1 %v4038_v18 }
 0x1b7   : > { %4016 = vmatprep.subr.bf16.mxu0 %v4291_v15  ;;  %3866 = vmatprep.subr.mxu1 %v4293_v23 }
 0x1b9   : > { %3794 = vmatmul.mubr.msk.f32.vlgmr.msra.gmra.mrb[8].mxu0 %vm978_vm1, %v4623_v39  ;;  %3849 = vmatmul.mubr.msk.f32.vlgmr.msra.gmra.mrb[8].mxu1 %vm978_vm1, %v4623_v39 }
 0x1ba   : > { %4018 = vmatpush3.bf16.msra.mxu0 %v4017_v21  ;;  %3815 = vmatprep.mubr.msk.f32.mxu0 %vm4292_vm2, %v4293_v23 }
 0x1bb   : > { %4019 = vmatprep.subr.bf16.mxu0 %v4291_v15  ;;  %3868 = vmatprep.mubr.msk.f32.mxu1 %vm4292_vm2, %v4293_v23 }
 0x1be   : > { %4021 = vmatpush3.bf16.msra.mxu0 %v4020_v25 }
 0x1bf   : > { %4028 = vmatprep.subr.bf16.mxu0 %v4291_v15 }
 0x1c1   : > { %3816 = vmatmul.mubr.msk.f32.vlgmr.msra.gmra.mrb[10].mxu0 %vm978_vm1, %v4623_v39 }
 0x1c2   : > { %4030 = vmatpush3.bf16.msra.mxu0 %v4029_v28  ;;  %3837 = vmatprep.mubr.msk.f32.mxu0 %vm4292_vm2, %v4293_v23 }
 0x1c3   : > { %4031 = vmatprep.subr.bf16.mxu0 %v4291_v15 }
 0x1c6   : > { %4033 = vmatpush3.bf16.msra.mxu0 %v4032_v31 }
 0x1c7   : > { %3851 = vmatprep.subr.mxu0 %v4293_v23 }
 0x1c9   : > { %3838 = vmatmul.mubr.msk.f32.vlgmr.msra.gmra.mrb[12].mxu0 %vm978_vm1, %v4623_v39 }
 0x1ca   : > { %3853 = vmatprep.mubr.msk.f32.mxu0 %vm4292_vm2, %v4293_v23 }
 0x26c   : > { %v1120_v32 = vpop.f32.mrb[0].mxu0  ;;  %v1330_v33 = vpop.f32.mrb[0].mxu1 }
 0x26d   : > { %v3729_v34 = vpop.f32.mrb[1].mxu0  ;;  %v3762_v35 = vpop.f32.mrb[1].mxu1  ;;  %v1331_v47 = vadd.f32 %v3552_v44, %v1330_v33  ;;  %v1121_v58 = vadd.f32 %v3549_v52, %v1120_v32 }
 0x274   : > { %v1190_v36 = vpop.f32.mrb[2].mxu0  ;;  %v1514_v37 = vpop.f32.mrb[2].mxu1 }
 0x275   : > { %v3740_v38 = vpop.f32.mrb[3].mxu0  ;;  %v3784_v40 = vpop.f32.mrb[3].mxu1  ;;  %v1515_v60 = vadd.f32 %v3558_v57, %v1514_v37  ;;  %v1191_v62 = vadd.f32 %v3550_v59, %v1190_v36 }
 0x27c   : > { %v1260_v42 = vpop.f32.mrb[4].mxu0  ;;  %v1654_v43 = vpop.f32.mrb[4].mxu1 }
 0x27d   : > { %v1655_v39 = vadd.f32 %v3560_v41, %v1654_v43  ;;  %v3751_v45 = vpop.f32.mrb[5].mxu0  ;;  %v3806_v46 = vpop.f32.mrb[5].mxu1  ;;  %v1261_v6 = vadd.f32 %v3551_v1, %v1260_v42  ;;  %v3568_v1 = vld [vmem:[%s5057_s23 + $0x3] ss:$0 sm:$0xff] }
 0x27f   : > { %3867 = vmatpush3.xpose.msk.msra.mxu1 %vm1982_vm3, %v1655_v39 }
 0x280   : > { %3876 = vmatprep.subr.mxu1 %v4293_v23 }
 0x282   : > { %3869 = vmatmul.mubr.msk.f32.vlgmr.msra.gmra.mrb[10].mxu1 %vm1982_vm3, %v1331_v47 }
 0x283   : > { %3878 = vmatprep.mubr.msk.f32.mxu1 %vm4292_vm2, %v4293_v23 }
 0x284   : > { %v1444_v50 = vpop.f32.mrb[6].mxu0  ;;  %v1838_v51 = vpop.f32.mrb[6].mxu1 }
 0x285   : > { %v1445_v53 = vadd.f32 %v3557_v48, %v1444_v50  ;;  %v1839_v54 = vadd.f32 %v3566_v49, %v1838_v51  ;;  %v3773_v55 = vpop.f32.mrb[7].mxu0  ;;  %v3828_v56 = vpop.f32.mrb[7].mxu1 }
 0x287   : > { %3852 = vmatpush3.xpose.msk.msra.mxu0 %vm1982_vm3, %v1445_v53  ;;  %3877 = vmatpush3.msra.mxu1 %v1839_v54 }
 0x288   : > { %3856 = vmatprep.subr.mxu0 %v4293_v23  ;;  %3886 = vmatprep.subr.mxu1 %v4293_v23 }
 0x28a   : > { %3854 = vmatmul.mubr.msk.f32.vlgmr.msra.gmra.mrb[14].mxu0 %vm1982_vm3, %v1121_v58 }
 0x28b   : > { %3857 = vmatpush3.xpose.msk.msra.mxu0 %vm1982_vm3, %v1515_v60  ;;  %3858 = vmatprep.mubr.msk.f32.mxu0 %vm4292_vm2, %v4293_v23  ;;  %v3567_v60 = vld [vmem:[%s5057_s23 + $0x2] ss:$0 sm:$0xff] }
 0x28c   : > { %v1584_v63 = vpop.f32.mrb[8].mxu0  ;;  %v4748_v0 = vpop.f32.mrb[8].mxu1  ;;  %3861 = vmatprep.subr.mxu0 %v4293_v23 }
 0x28d   : > { %v1585_v2 = vadd.f32 %v3559_v61, %v1584_v63  ;;  %v3795_v4 = vpop.f32.mrb[9].mxu0  ;;  %v3850_v5 = vpop.f32.mrb[9].mxu1 }
 0x28e   : > { %3859 = vmatmul.mubr.msk.f32.vlgmr.msra.gmra.mrb[16].mxu0 %vm1982_vm3, %v1191_v62  ;;  %v1979_v5 = vadd.f32 %v3568_v1, %v4748_v0  ;;  %v2632_v0 = vld [vmem:[%s5059_s9] sm:$0xff]  ;;  %v3068_v1 = vld [vmem:[%s4570_s17 + $0x18] sm:$0xff] }
 0x28f   : > { %3862 = vmatpush3.xpose.msk.msra.mxu0 %vm1982_vm3, %v1585_v2  ;;  %3863 = vmatprep.mubr.msk.f32.mxu0 %vm4292_vm2, %v4293_v23 }
 0x290   : > { %3871 = vmatprep.subr.mxu0 %v4293_v23 }
 0x292   : > { %3864 = vmatmul.mubr.msk.f32.vlgmr.msra.gmra.mrb[18].mxu0 %vm1982_vm3, %v1261_v6 }
 0x293   : > { %3873 = vmatprep.mubr.msk.f32.mxu0 %vm4292_vm2, %v4293_v23 }
 0x294   : > { %v1768_v8 = vpop.f32.mrb[10].mxu0 }
 0x295   : > { %v1769_v9 = vadd.f32 %v3565_v7, %v1768_v8  ;;  %v3817_v10 = vpop.f32.mrb[11].mxu0 }
 0x296   : > { %v2633_v10 = vld [vmem:[%s5059_s9 + $0x8] sm:$0xff] }
 0x297   : > { %3872 = vmatpush3.msra.mxu0 %v1769_v9 }
 0x298   : > { %3881 = vmatprep.subr.mxu0 %v4293_v23 }
 0x29c   : > { %v4762_v11 = vpop.f32.mrb[12].mxu0 }
 0x29d   : > { %v3839_v12 = vpop.f32.mrb[13].mxu0  ;;  %v1909_v63 = vadd.f32 %v3567_v60, %v4762_v11  ;;  %v2634_v11 = vld [vmem:[%s5059_s9 + $0x10] sm:$0xff]  ;;  %v3065_v60 = vld [vmem:[%s4570_s17] sm:$0xff] }
 0x355   : > { %v2283_v13 = vpop.f32.mrb[10].mxu1 }
 0x356   : > { %v3870_v14 = vpop.f32.mrb[11].mxu1  ;;  %v2290_v22 = vmul.f32 0.35355338, %v2283_v13 }
 0x357   : > { %v2635_v14 = vld [vmem:[%s5059_s9 + $0x18] sm:$0xff] }
 0x358   : > { %v2295_v32 = vadd.f32 %v2291_v19, %v2290_v22 }
 0x35a   : > { %v2305_v34 = vsel %vm1982_vm3, %v2295_v32, -inf }
 0x35d   : > { %v2055_v16 = vpop.f32.mrb[14].mxu0 }
 0x35e   : > { %v2287_v17 = vmul.f32 0.35355338, %v2055_v16  ;;  %v3855_v18 = vpop.f32.mrb[15].mxu0 }
 0x360   : > { %v2292_v20 = vadd.f32 %v2291_v19, %v2287_v17 }
 0x361   : > { %v2131_v21 = vpop.f32.mrb[16].mxu0 }
 0x362   : > { %v2288_v24 = vmul.f32 0.35355338, %v2131_v21  ;;  %v3860_v25 = vpop.f32.mrb[17].mxu0  ;;  %v2296_v26 = vsel %vm1982_vm3, %v2292_v20, -inf }
 0x363   : > { %2297 = vmax.xlane.f32.xlu1 %v2296_v26 }
 0x364   : > { %v2293_v27 = vadd.f32 %v2291_v19, %v2288_v24 }
 0x365   : > { %v2207_v28 = vpop.f32.mrb[18].mxu0 }
 0x366   : > { %v2289_v29 = vmul.f32 0.35355338, %v2207_v28  ;;  %v3865_v30 = vpop.f32.mrb[19].mxu0  ;;  %v2299_v31 = vsel %vm1982_vm3, %v2293_v27, -inf }
 0x367   : > { %2300 = vmax.xlane.f32.xlu1 %v2299_v31 }
 0x368   : > { %v2294_v33 = vadd.f32 %v2291_v19, %v2289_v29 }
 0x36a   : > { %v2302_v35 = vsel %vm1982_vm3, %v2294_v33, -inf }
 0x36b   : > { %2306 = vmax.xlane.f32.xlu1 %v2305_v34  ;;  %2303 = vmax.xlane.f32.xlu0 %v2302_v35 }
 0x3f0   : > { %v2298_v36 = vpop.xlane.xlu1 %2297 }
 0x3f1   : > { %v2308_v37 = vsub.f32 %v2292_v20, %v2298_v36  ;;  %v3589_v36 = vld [vmem:[%s5060_s28] ss:$0 sm:$0xff] }
 0x3f3   : > { %v2312_v38 = vmul.f32 1.442695, %v2308_v37 }
 0x3f4   : > { %v2301_v40 = vpop.xlane.xlu1 %2300 }
 0x3f5   : > { %4156 = vpow2.f32 %v2312_v38  ;;  %v2309_v41 = vsub.f32 %v2293_v27, %v2301_v40 }
 0x3f7   : > { %v2314_v42 = vmul.f32 1.442695, %v2309_v41 }
 0x3f8   : > { %v2307_v43 = vpop.xlane.xlu1 %2306  ;;  %v2304_v44 = vpop.xlane.xlu0 %2303 }
 0x3f9   : > { %4158 = vpow2.f32 %v2314_v42  ;;  %v2311_v39 = vsub.f32 %v2295_v32, %v2307_v43  ;;  %v2310_v45 = vsub.f32 %v2294_v33, %v2304_v44 }
 0x3fb   : > { %v2318_v46 = vmul.f32 1.442695, %v2311_v39  ;;  %v2316_v47 = vmul.f32 1.442695, %v2310_v45 }
 0x3fd   : > { %4160 = vpow2.f32 %v2318_v46  ;;  %v2973_v46 = vld [vmem:[%s4561_s11] sm:$0xff] }
 0x3fe   : > { %4162 = vpow2.f32 %v2316_v47  ;;  %v2974_v47 = vld [vmem:[%s4561_s11 + $0x8] sm:$0xff] }
 0x3ff   : > { %v4157_v48 = vpop.eup %4156 }
 0x400   : > { %v2320_v49 = vsel %vm1982_vm3, %v4157_v48, 0.0 }
 0x401   : > { %2321 = vadd.xlane.f32.xlu0 %v2320_v49  ;;  %v2976_v49 = vld [vmem:[%s4561_s11 + $0x18] sm:$0xff] }
 0x403   : > { %v4159_v50 = vpop.eup %4158 }
 0x404   : > { %v2323_v51 = vsel %vm1982_vm3, %v4159_v50, 0.0 }
 0x405   : > { %2324 = vadd.xlane.f32.xlu1 %v2323_v51 }
 0x407   : > { %v4161_v52 = vpop.eup %4160 }
 0x408   : > { %v4163_v53 = vpop.eup %4162  ;;  %v2329_v54 = vsel %vm1982_vm3, %v4161_v52, 0.0 }
 0x409   : > { %2330 = vadd.xlane.f32.xlu1 %v2329_v54  ;;  %v2326_v55 = vsel %vm1982_vm3, %v4163_v53, 0.0 }
 0x40a   : > { %2327 = vadd.xlane.f32.xlu0 %v2326_v55  ;;  %v3590_v55 = vld [vmem:[%s5061_s12] ss:$0 sm:$0xff] }
 0x48e   : > { %v2322_v56 = vpop.xlane.xlu0 %2321 }
 0x48f   : > { %4164 = vrcp.f32 %v2322_v56 }
 0x492   : > { %v2325_v57 = vpop.xlane.xlu1 %2324 }
 0x493   : > { %4166 = vrcp.f32 %v2325_v57 }
 0x496   : > { %v2331_v58 = vpop.xlane.xlu1 %2330 }
 0x497   : > { %4168 = vrcp.f32 %v2331_v58  ;;  %v2328_v59 = vpop.xlane.xlu0 %2327 }
 0x498   : > { %4170 = vrcp.f32 %v2328_v59 }
 0x499   : > { %v4165_v61 = vpop.eup %4164 }
 0x49a   : > { %v2333_v62 = vmul.f32 %v4165_v61, %v4157_v48  ;;  %v4041_v48 = vpack.c.bf16 %v2974_v47, %v2973_v46  ;;  %v3066_v61 = vld [vmem:[%s4570_s17 + $0x8] sm:$0xff] }
 0x49c   : > { %3874 = vmatmul.mubr.msk.f32.vlgmr.msra.gmra.mrb[20].mxu0 %vm1982_vm3, %v2333_v62  ;;  %v4047_v62 = vpack.c.bf16 %v3066_v61, %v3065_v60 }
 0x49d   : > { %v4167_v2 = vpop.eup %4166  ;;  %3882 = vmatpush3.msra.mxu0 %v1909_v63  ;;  %3883 = vmatprep.mubr.msk.f32.mxu0 %vm4292_vm2, %v4293_v23  ;;  %v3067_v63 = vld [vmem:[%s4570_s17 + $0x10] sm:$0xff] }
 0x49e   : > { %v2335_v4 = vmul.f32 %v4167_v2, %v4159_v50  ;;  %3891 = vmatprep.subr.mxu0 %v4293_v23  ;;  %v4050_v2 = vpack.c.bf16 %v3068_v1, %v3067_v63 }
 0x4a0   : > { %3879 = vmatmul.mubr.msk.f32.vlgmr.msra.gmra.mrb[12].mxu1 %vm1982_vm3, %v2335_v4  ;;  %v3069_v4 = vld [vmem:[%s4570_s17 + $0x20] sm:$0xff] }
 0x4a1   : > { %v4169_v6 = vpop.eup %4168  ;;  %3887 = vmatpush3.msra.mxu1 %v1979_v5  ;;  %3888 = vmatprep.mubr.msk.f32.mxu1 %vm4292_vm2, %v4293_v23  ;;  %v3070_v5 = vld [vmem:[%s4570_s17 + $0x28] sm:$0xff] }
 0x4a2   : > { %v4171_v7 = vpop.eup %4170  ;;  %v2339_v8 = vmul.f32 %v4169_v6, %v4161_v52  ;;  %3896 = vmatprep.subr.mxu1 %v4293_v23  ;;  %v4053_v6 = vpack.c.bf16 %v3070_v5, %v3069_v4 }
 0x4a3   : > { %v2337_v9 = vmul.f32 %v4171_v7, %v4163_v53  ;;  %v3071_v7 = vld [vmem:[%s4570_s17 + $0x30] sm:$0xff] }
 0x4a4   : > { %3889 = vmatmul.mubr.msk.f32.vlgmr.msra.gmra.mrb[14].mxu1 %vm1982_vm3, %v2339_v8  ;;  %v3072_v8 = vld [vmem:[%s4570_s17 + $0x38] sm:$0xff] }
 0x4a5   : > { %3884 = vmatmul.mubr.msk.f32.vlgmr.msra.gmra.mrb[22].mxu0 %vm1982_vm3, %v2337_v9  ;;  %3898 = vmatprep.mubr.msk.f32.mxu1 %vm4292_vm2, %v4293_v23  ;;  %v4056_v9 = vpack.c.bf16 %v3072_v8, %v3071_v7 }
 0x4a6   : > { %3893 = vmatprep.mubr.msk.f32.mxu0 %vm4292_vm2, %v4293_v23  ;;  %3892 = vmatpush3.msra.mxu0 %v2632_v0  ;;  %v3073_v0 = vld [vmem:[%s4570_s17 + $0x40] sm:$0xff] }
 0x4a7   : > { %3901 = vmatprep.subr.mxu0 %v4293_v23  ;;  %3897 = vmatpush3.msra.mxu1 %v2633_v10  ;;  %v3074_v10 = vld [vmem:[%s4570_s17 + $0x48] sm:$0xff] }
 0x4a8   : > { %3906 = vmatprep.subr.mxu1 %v4293_v23 }
 0x56f   : > { %v2409_v12 = vpop.f32.mrb[20].mxu0 }
 0x570   : > { %v3875_v13 = vpop.f32.mrb[21].mxu0  ;;  %3894 = vmatmul.mubr.msk.f32.vlgmr.msra.gmra.mrb[24].mxu0 %vm1982_vm3, %v2409_v12  ;;  %v3075_v12 = vld [vmem:[%s4570_s17 + $0x50] sm:$0xff] }
 0x571   : > { %3902 = vmatpush3.msra.mxu0 %v2634_v11  ;;  %3903 = vmatprep.mubr.msk.f32.mxu0 %vm4292_vm2, %v4293_v23  ;;  %v4059_v11 = vpack.c.bf16 %v3074_v10, %v3073_v0  ;;  %v3076_v13 = vld [vmem:[%s4570_s17 + $0x58] sm:$0xff] }
 0x572   : > { %4040 = vmatprep.subr.bf16.mxu0 %v4291_v15 }
 0x573   : > { %v2482_v16 = vpop.f32.mrb[12].mxu1 }
 0x574   : > { %v3880_v17 = vpop.f32.mrb[13].mxu1  ;;  %3899 = vmatmul.mubr.msk.f32.vlgmr.msra.gmra.mrb[16].mxu1 %vm1982_vm3, %v2482_v16  ;;  %v3077_v16 = vld [vmem:[%s4570_s17 + $0x60] sm:$0xff] }
 0x575   : > { %3907 = vmatpush3.msra.mxu1 %v2635_v14  ;;  %3908 = vmatprep.mubr.msk.f32.mxu1 %vm4292_vm2, %v4293_v23  ;;  %v4062_v14 = vpack.c.bf16 %v3076_v13, %v3075_v12  ;;  %v3078_v17 = vld [vmem:[%s4570_s17 + $0x68] sm:$0xff] }
 0x576   : > { %4046 = vmatprep.subr.bf16.mxu1 %v4291_v15 }
 0x577   : > { %v2628_v18 = vpop.f32.mrb[14].mxu1 }
 0x578   : > { %v2555_v19 = vpop.f32.mrb[22].mxu0  ;;  %v3890_v20 = vpop.f32.mrb[15].mxu1  ;;  %3909 = vmatmul.mubr.msk.f32.vlgmr.msra.gmra.mrb[18].mxu1 %vm1982_vm3, %v2628_v18  ;;  %v4065_v18 = vpack.c.bf16 %v3078_v17, %v3077_v16 }
 0x579   : > { %v3885_v21 = vpop.f32.mrb[23].mxu0  ;;  %3904 = vmatmul.mubr.msk.f32.vlgmr.msra.gmra.mrb[26].mxu0 %vm1982_vm3, %v2555_v19  ;;  %3954 = vmatprep.mubr.msk.f32.mxu1 %vm4292_vm2, %v4293_v23  ;;  %v3079_v19 = vld [vmem:[%s4570_s17 + $0x70] sm:$0xff]  ;;  %v3080_v20 = vld [vmem:[%s4570_s17 + $0x78] sm:$0xff] }
 0x57a   : > { %3919 = vmatprep.mubr.msk.f32.mxu0 %vm4292_vm2, %v4293_v23  ;;  %4042 = vmatpush3.bf16.msra.mxu0 %v4041_v48  ;;  %v4068_v21 = vpack.c.bf16 %v3080_v20, %v3079_v19 }
 0x57b   : > { %4043 = vmatprep.subr.bf16.mxu0 %v4291_v15  ;;  %4048 = vmatpush3.bf16.msra.mxu1 %v4047_v62 }
 0x57c   : > { %4049 = vmatprep.subr.bf16.mxu1 %v4291_v15 }
 0x57f   : > { %4051 = vmatpush3.bf16.msra.mxu1 %v4050_v2 }
 0x580   : > { %4052 = vmatprep.subr.bf16.mxu1 %v4291_v15 }
 0x583   : > { %4054 = vmatpush3.bf16.msra.mxu1 %v4053_v6 }
 0x584   : > { %4055 = vmatprep.subr.bf16.mxu1 %v4291_v15 }
 0x587   : > { %4057 = vmatpush3.bf16.msra.mxu1 %v4056_v9 }
 0x588   : > { %4058 = vmatprep.subr.bf16.mxu1 %v4291_v15 }
 0x58b   : > { %4060 = vmatpush3.bf16.msra.mxu1 %v4059_v11 }
 0x58c   : > { %4061 = vmatprep.subr.bf16.mxu1 %v4291_v15 }
 0x58f   : > { %4063 = vmatpush3.bf16.msra.mxu1 %v4062_v14 }
 0x590   : > { %4064 = vmatprep.subr.bf16.mxu1 %v4291_v15 }
 0x593   : > { %4066 = vmatpush3.bf16.msra.mxu1 %v4065_v18 }
 0x594   : > { %4067 = vmatprep.subr.bf16.mxu1 %v4291_v15 }
 0x597   : > { %4069 = vmatpush3.bf16.msra.mxu1 %v4068_v21 }
 0x643   : > { %v2705_v22 = vpop.f32.mrb[24].mxu0 }
 0x644   : > { %v3895_v24 = vpop.f32.mrb[25].mxu0  ;;  %v2928_v26 = vsel %vm978_vm1, %v2705_v22, 0.0  ;;  %v3592_v22 = vld [vmem:[%s957_s24] ss:$0 sm:$0xff]  ;;  %s5065_s24 = sld [smem:[#allocation11_spill]] }
 0x647   : > { %v2778_v25 = vpop.f32.mrb[16].mxu1 }
 0x648   : > { %v2929_v27 = vsel %vm978_vm1, %v2778_v25, 0.0  ;;  %v3900_v28 = vpop.f32.mrb[17].mxu1 }
 0x649   : > { %v2930_v29 = vadd.f32 %v2929_v27, %v2928_v26 }
 0x64a   : > { %p3596_p6 = scmp.ne.s32.totalorder %s5065_s24, 1 }
 0x64b   : > { %v2924_v30 = vpop.f32.mrb[18].mxu1  ;;  %s5066_s0 = sld [smem:[#allocation12_spill]] (!%p3596_p6)  ;;  %s5067_s3 = sld [smem:[#allocation41_spill]] (!%p3596_p6)  ;;  %vm4296_vm5 = vmmov (!%p3596_p6), 0   ;;  %vm3273_vm6 = vcmask (!%p3596_p6), 122880  }
 0x64c   : > { %v2851_v31 = vpop.f32.mrb[26].mxu0  ;;  %v3910_v32 = vpop.f32.mrb[19].mxu1  ;;  %v2933_v23 = vsel %vm978_vm1, %v2924_v30, 0.0  ;;  %s5068_s12 = sld [smem:[#allocation39_spill]] (!%p3596_p6) }
 0x64d   : > { %v2931_v33 = vsel %vm978_vm1, %v2851_v31, 0.0  ;;  %v3905_v34 = vpop.f32.mrb[27].mxu0  ;;  %v3595_v32 = vld [vmem:[%s965_s30] ss:$0 sm:$0xff] }
 0x64e   : > { %v2932_v35 = vadd.f32 %v2931_v33, %v2930_v29 }
 0x650   : > { %v2934_v37 = vadd.f32 %v2933_v23, %v2932_v35 }
 0x651   : > { %s3164_s23 = sld [smem:[#allocation4 + %s5066_s0]] (!%p3596_p6) }
 0x652   : > { %v2942_v38 = vadd.f32 %v3589_v36, %v2934_v37  ;;  %v3165_v36 = vlaneseq (!%p3596_p6)  ;;  %v3179_v2 = vld [vmem:[%s5068_s12] sm:$0x1] (!%p3596_p6) }
 0x654   : > { %v4823_v40 = vadd.f32 %v2942_v38, %v4584_v3  ;;  %v2975_v3 = vld [vmem:[%s4561_s11 + $0x10] sm:$0xff]  ;;  %s5062_s11 = scalar_lea.vmem %s4974_s15, %s4495_s7  ;;  %v3166_v37 = vshrl.u32 (!%p3596_p6), %v3165_v36, 7 }
 0x655   : > { %v4044_v50 = vpack.c.bf16 %v2976_v49, %v2975_v3  ;;  %v3591_v57 = vld [vmem:[%s5062_s11] ss:$0 sm:$0xff]  ;;  %s5069_s11 = sld [smem:[#allocation40_spill]] (!%p3596_p6) }
 0x656   : > { %v2946_v41 = vsel %vm978_vm1, %v4823_v40, 0.0 }
 0x657   : > { %2947 = vadd.xlane.f32.xlu0 %v2946_v41  ;;  %4045 = vmatpush3.bf16.msra.mxu0 %v4044_v50  ;;  %v3167_v38 = vstv (!%p3596_p6), %s3164_s23  ;;  %v4294_v41 = vmov (!%p3596_p6), 0.0  }
 0x658   : > { %vm3168_vm4 = vcmp.eq.s32.totalorder (!%p3596_p6), %v3166_v37, %v3167_v38 }
 0x65b   : > { %v3180_v5 = vld [vmem:[%s5069_s11] sm:$0x1] (!%p3596_p6) }
 0x6e4   : > { %v2948_v42 = vpop.xlane.xlu0 %2947 }
 0x6e5   : > { %v2949_v43 = vmul.f32 0.03125, %v2948_v42  ;;  %v3597_v42 = vsel (!%p3596_p6), %vm3168_vm4, 1.0, %v4294_v41 }
 0x6e7   : > { %v2950_v44 = vsub.f32 %v4823_v40, %v2949_v43 }
 0x6e9   : > { %v2951_v39 = vmul.f32 %v2950_v44, %v2950_v44 }
 0x6eb   : > { %v2952_v45 = vsel %vm978_vm1, %v2951_v39, 0.0 }
 0x6ec   : > { %2953 = vadd.xlane.f32.xlu1 %v2952_v45 }
 0x779   : > { %v2954_v51 = vpop.xlane.xlu1 %2953 }
 0x77a   : > { %v2955_v52 = vmul.f32 0.03125, %v2954_v51 }
 0x77c   : > { %v2956_v53 = vadd.f32 1e-05, %v2955_v52 }
 0x77e   : > { %4172 = vrsqrt.f32 %v2956_v53 }
 0x788   : > { %v4173_v54 = vpop.eup %4172 }
 0x789   : > { %v2958_v56 = vmul.f32 %v4173_v54, %v2950_v44  ;;  %v3196_v54 = vld [vmem:[%s5067_s3] sm:$0xff] (!%p3596_p6) }
 0x78b   : > { %v2965_v58 = vmul.f32 %v3590_v55, %v2958_v56  ;;  %v3197_v55 = vld [vmem:[%s5067_s3 + $0x8] sm:$0xff] (!%p3596_p6)  ;;  %v3198_v56 = vld [vmem:[%s5067_s3 + $0x10] sm:$0xff] (!%p3596_p6) }
 0x78d   : > { %v2972_v59 = vadd.f32 %v3591_v57, %v2965_v58  ;;  %v4295_v57 = vmov (!%p3596_p6), 0.0|0.0   ;;  %v4071_v58 = vpack.c.bf16 (!%p3596_p6), %v3197_v55, %v3196_v54 }
 0x78e   : > { %4070 = vmatprep.subr.bf16.mxu0 (!%p3596_p6), %v4295_v57 }
 0x78f   : > { %3920 = vmatmul.mubr.msk.f32.vlgmr.msra.gmra.mrb[28].mxu0 %vm978_vm1, %v2972_v59  ;;  %v3199_v59 = vld [vmem:[%s5067_s3 + $0x18] sm:$0xff] (!%p3596_p6) }
 0x790   : > { %3965 = vmatprep.mubr.msk.f32.mxu0 (!%p3596_p6), %vm4296_vm5, %v4294_v41  ;;  %4072 = vmatpush3.bf16.msra.mxu0 (!%p3596_p6), %v4071_v58  ;;  %v4074_v60 = vpack.c.bf16 (!%p3596_p6), %v3199_v59, %v3198_v56 }
 0x791   : > { %4073 = vmatprep.subr.bf16.mxu0 (!%p3596_p6), %v4295_v57 }
 0x794   : > { %4075 = vmatpush3.bf16.msra.mxu0 (!%p3596_p6), %v4074_v60 }
 0x862   : > { %v3053_v24 = vpop.f32.mrb[28].mxu0 }
 0x863   : > { %v3054_v25 = vadd.f32 %v3592_v22, %v3053_v24  ;;  %v3921_v26 = vpop.f32.mrb[29].mxu0 }
 0x865   : > { %v3594_v27 = vmul.f32 -1.702, %v3054_v25 }
 0x867   : > { %v3059_v28 = vmul.f32 1.442695, %v3594_v27 }
 0x869   : > { %4174 = vpow2.f32 %v3059_v28 }
 0x873   : > { %v4175_v29 = vpop.eup %4174 }
 0x874   : > { %v3061_v30 = vadd.f32 1.0, %v4175_v29 }
 0x876   : > { %4176 = vrcp.f32 %v3061_v30 }
 0x880   : > { %v4177_v15 = vpop.eup %4176 }
 0x881   : > { %v3064_v31 = vmul.f32 %v4177_v15, %v3054_v25 }
 0x883   : > { %3955 = vmatmul.mubr.f32.vlgmr.msra.gmra.mrb[20].mxu1 %v3064_v31 }
 0x955   : > { %3163 = sbr.rel (%p3596_p6) target bundleno = 2936 (0xb78), region = 116 }
 0x956   : > { %v3154_v33 = vpop.f32.mrb[20].mxu1 }
 0x957   : > { %v3155_v34 = vadd.f32 %v3595_v32, %v3154_v33  ;;  %v3956_v35 = vpop.f32.mrb[21].mxu1 }
 0x959   : > { %v3158_v23 = vadd.f32 %v3155_v34, %v4823_v40 }
 0x95b   : > { %3159 = vst.msk [vmem:[#allocation2] sm:$0xff] %vm978_vm1, %v3158_v23  ;;  %v3171_v43 = vmul.f32 (!%p3596_p6), %v3597_v42, %v3158_v23 }
 0x95d   : > { %v3172_v44 = vsel %vm978_vm1, %v3171_v43, 0.0 }
 0x95e   : > { %v3173_v39 = vrot.slane %v3172_v44, 4 }
 0x960   : > { %v3174_v45 = vadd.f32 %v3173_v39, %v3172_v44 }
 0x962   : > { %v3175_v46 = vrot.slane %v3174_v45, 2 }
 0x964   : > { %v3176_v40 = vadd.f32 %v3175_v46, %v3174_v45 }
 0x966   : > { %v3177_v47 = vrot.slane %v3176_v40, 1 }
 0x968   : > { %v3178_v48 = vadd.f32 %v3177_v47, %v3176_v40 }
 0x96a   : > { %v3181_v3 = vsel %vm978_vm1, %v3178_v48, 0.0 }
 0x96b   : > { %3182 = vadd.xlane.f32.xlu0 %v3181_v3 }
 0x9f8   : > { %v3183_v49 = vpop.xlane.xlu0 %3182 }
 0x9f9   : > { %v3184_v50 = vmul.f32 0.03125, %v3183_v49 }
 0x9fb   : > { %v3185_v51 = vsub.f32 %v3178_v48, %v3184_v50 }
 0x9fd   : > { %v3186_v52 = vmul.f32 %v3185_v51, %v3185_v51 }
 0x9ff   : > { %v3187_v53 = vsel %vm978_vm1, %v3186_v52, 0.0 }
 0xa00   : > { %3188 = vadd.xlane.f32.xlu0 %v3187_v53 }
 0xa8d   : > { %v3189_v61 = vpop.xlane.xlu0 %3188 }
 0xa8e   : > { %v3190_v62 = vmul.f32 0.03125, %v3189_v61 }
 0xa90   : > { %v3191_v63 = vadd.f32 1e-05, %v3190_v62 }
 0xa92   : > { %4178 = vrsqrt.f32 %v3191_v63 }
 0xa9c   : > { %v4179_v1 = vpop.eup %4178 }
 0xa9d   : > { %v3193_v4 = vmul.f32 %v4179_v1, %v3185_v51 }
 0xa9f   : > { %v3194_v6 = vmul.f32 %v3193_v4, %v3179_v2 }
 0xaa1   : > { %v3195_v7 = vadd.f32 %v3194_v6, %v3180_v5 }
 0xaa3   : > { %3966 = vmatmul.mubr.msk.f32.vlgmr.msra.gmra.mrb[0].mxu0 %vm978_vm1, %v3195_v7 }
 0xb76   : > { %v3269_v8 = vpop.f32.mrb[0].mxu0 }
 0xb77   : > { %3274 = vst.msk [vmem:[%s4578_s6] sm:$0x1] %vm3273_vm6, %v3269_v8  ;;  %v3967_v9 = vpop.f32.mrb[1].mxu0 }
 0xb78 PF: > { %s5070_s5 = sld [smem:[#allocation12_spill]]  ;;  %s5072_s2 = sld [smem:[#allocation42_spill]] }
 0xb79   : > { %s3288_s23 = sshll.u32 %s4578_s6, 4  ;;  %s5074_s7 = sand.u32 1, %s4264_s26   ;;  %s3289_s23 = int_to_ptr.vmem [resolvable:$true] %s3288_s23 }
 0xb7a   : > { %s3276_s30 = scalar_lea.sflag [#allocation6], %s5074_s7  ;;  %s4192_s27 = scalar_lea.vmem %s3289_s23, 16 }
 0xb7b   : > { %p4193_p7 = scmp.ne.s32.totalorder %s3289_s23, %s4192_s27  ;;  %s4297_s8 = smov [#allocation5]  }
 0xb7c   : > { %s4196_s9 = sshll.u32 %s4297_s8, 4  ;;  %s4197_s9 = int_to_ptr.vmem [resolvable:$false] %s4196_s9 }
 0xb7d   : > { %p4194_p9 = pnand %p4193_p7, %p4470_p8  ;;  %s4198_s19 = scalar_lea.vmem %s4197_s9, 32 }
 0xb7e   : > { %s3599_s21 = sshll.u32 %s5070_s5, 4  ;;  %s5073_s24 = smov %s5072_s2 }
 0xb7f   : > { %s4909_s0 = scalar_lea.hbm %s5072_s2, %s3599_s21  ;;  %p4195_p10 = pneg %p4194_p9 }
 0xb80   : > { %p4199_p11 = scmp.lt.s32.totalorder %s3289_s23, %s4197_s9  ;;  %p4200_p12 = scmp.lt.s32.totalorder %s4198_s19, %s4192_s27 }
 0xb82   : > { %p4201_p13 = por %p4200_p12, %p4199_p11 }
 0xb84   : > { %p4202_p1 = pnand %p4201_p13, %p4195_p10 }
 0xb86   : > { %4205 = shalt.err (!%p4202_p1)
}
 0xb87   : > { %s4206_s6 = scalar_lea.hbm %s4909_s0, 16  ;;  %s4210_s1 = scalar_lea.hbm %s5073_s24, 32 }
 0xb88   : > { %p4207_p2 = scmp.ne.s32.totalorder %s4909_s0, %s4206_s6  ;;  %p4211_p5 = scmp.lt.u32.totalorder %s4909_s0, %s5073_s24 }
 0xb89   : > { %p4212_p6 = scmp.lt.u32.totalorder %s4210_s1, %s4206_s6  ;;  %p4214_p9 = scmp.lt.u32.totalorder %s4206_s6, %s4909_s0 }
 0xb8a   : > { %p4208_p3 = pnand %p4207_p2, %p4470_p8 }
 0xb8b   : > { %p4213_p7 = por %p4212_p6, %p4211_p5 }
 0xb8c   : > { %p4209_p4 = pneg %p4208_p3 }
 0xb8d   : > { %p4215_p10 = por %p4214_p9, %p4213_p7 }
 0xb8f   : > { %p4216_p11 = pnand %p4215_p10, %p4209_p4 }
 0xb91   : > { %4219 = shalt.err (!%p4216_p11)
}
 0xb92   : > { %4076 = dma.vmem_to_hbm [thread:$0]  (%p4470_p8), %s3289_s23, 16, %s4909_s0, %s3276_s30  }
 0xb93 PF: > { %s5075_s20 = sld [smem:[#allocation15_spill]]  ;;  %s5076_s29 = sld [smem:[#allocation9_spill]] }
 0xb99   : > { %p4082_p12 = scmp.ge.s32.totalorder %s5075_s20, 2  ;;  %s3300_s5 = sand.u32 1, %s5076_s29  }
 0xb9a   : > { %s3301_s21 = scalar_lea.sflag [#allocation6], %s3300_s5 }
 0xb9b   : > { %p4079_p13 = pnand %p4082_p12, %p4480_p0 }
 0xb9d   : > { %4255 = dma.done.wait (!%p4079_p13), %s3301_s21, 16  }
 0xb9e   : > { %4257 = vsyncadd (!%p4079_p13), %s3301_s21, 4294967280  ;;  %s42_s17 = sadd.s32 1, %s5075_s20   ;;  %s5078_s25 = sld [smem:[#allocation10_spill]] }
 0xb9f   : > { %p39_p1 = scmp.ge.s32.totalorder %s42_s17, 6   ;;  %s5079_s2 = sld [smem:[#allocation20_spill]] }
 0xba0   : > { %s5080_s6 = sld [smem:[#allocation13_spill]]  ;;  %s5081_s27 = sld [smem:[#allocation14_spill]] }
 0xba1   : > { %s5082_s7 = sld [smem:[#allocation16_spill]]  ;;  %s5083_s28 = sld [smem:[#allocation18_spill]] }
 0xba2   : > { %s5084_s1 = smov %s4264_s26  ;;  %41 = sbr.rel (!%p39_p1) target bundleno = 35 (0x23), region = 199 }
 0xba4   : > { %s5085_s26 = smov %s5078_s25 }
 0xba9   :  { %3305 = vsyncpa [#allocation6], 1 }
 0xbaa   :  { %3307 = vsyncpa [#allocation6 + $0x1], 1 }

</bundles_post_ra>
